<compile_context>
chip_gen: v6e
topology: v6e:2x2x1
jax: 0.10.0
libtpu: 0.0.40
codegen_flags: <defaults>
</compile_context>

<pallas_src>
import functools

import jax
import jax.numpy as jnp
from jax.experimental import pallas as pl
from jax.experimental.pallas import tpu as pltpu

# Conservative scoped-VMEM request, legal on v5e/v6e/v7x. At real resolutions raise
# per generation (v6e: ~64-96 MiB with TM~512; v7x: keep <= ~48 MiB, TM 256-384).
_VMEM_LIMIT = 32 * 1024 * 1024


def _round_up(x, m):
    return (x + m - 1) // m * m


def _row_tiles(m, cap=256):
    """Row-tile size TM and padded row count Mp for an (N, M, C) activation.

    Never falls back to a single whole-M block at large M (VMEM cliff on v7x):
    if no multiple-of-8 divisor <= cap exists, tile at `cap` and zero-pad M.
    """
    if m <= cap:
        return m, m                       # full-dim block: always legal
    for t in range(cap, 7, -8):
        if m % t == 0:
            return t, m
    return cap, _round_up(m, cap)


def _pick_th(h, w, cap=16):
    """Image rows per step for the fused MBConv kernel (divides H, TH*W % 8 == 0)."""
    for t in range(min(h, cap), 0, -1):
        if h % t == 0 and (t * w) % 8 == 0:
            return t
    return h


# --------------------------------------------------------------------------
# Kernel 1: tiled 1x1 conv (matmul + bias + optional swish).  Used for the stem.
# --------------------------------------------------------------------------

def _conv1x1_kernel(x_ref, w_ref, b_ref, o_ref, *, act):
    y = jnp.dot(x_ref[0], w_ref[...], preferred_element_type=jnp.float32)
    y = y + b_ref[...]
    if act:
        y = y * jax.nn.sigmoid(y)          # Swish in f32 (EUP sigmoid, VPU mul)
    o_ref[0] = y.astype(o_ref.dtype)


def conv1x1(x, w, b, act, cap=256):
    """x: (N, M, K) bf16; w: (K, Cout) bf16; b: (Cout,) f32 -> (N, M, Cout) bf16."""
    N, M, K = x.shape
    Cout = w.shape[1]
    TM, Mp = _row_tiles(M, cap)
    if Mp != M:
        x = jnp.pad(x, ((0, 0), (0, Mp - M), (0, 0)))
    out = pl.pallas_call(
        functools.partial(_conv1x1_kernel, act=act),
        grid=(N, Mp // TM),
        in_specs=[
            pl.BlockSpec((1, TM, K), lambda n, m: (n, m, 0)),
            pl.BlockSpec((K, Cout), lambda n, m: (0, 0)),
            pl.BlockSpec((1, Cout), lambda n, m: (0, 0)),
        ],
        out_specs=pl.BlockSpec((1, TM, Cout), lambda n, m: (n, m, 0)),
        out_shape=jax.ShapeDtypeStruct((N, Mp, Cout), jnp.bfloat16),
        compiler_params=pltpu.CompilerParams(
            dimension_semantics=("parallel", "parallel"),
            vmem_limit_bytes=_VMEM_LIMIT),
    )(x, w, b.reshape(1, Cout))
    return out if Mp == M else out[:, :M]


# --------------------------------------------------------------------------
# Kernel 2: fused MBConv front end
#   expand 1x1 (+BN+swish) -> depthwise 3x3 stride 1 (+BN+swish) -> SE spatial sum
#   Grid (N, H//TH): each step reads TH image rows plus a 1-row halo on each side
#   (read amplification (TH+2)/TH of the *narrow* block input), expands them in
#   VMEM (the wide activation never hits HBM), applies the depthwise taps and
#   accumulates the SE squeeze into a resident (1,1,Cmid) output block.
# --------------------------------------------------------------------------

def _expand_dw_kernel(xm_ref, x0_ref, xp_ref, we_ref, be_ref, wd_ref, bd_ref,
                      d_ref, ssum_ref, *, w_img):
    hb = pl.program_id(1)
    nhb = pl.num_programs(1)
    W = w_img
    THW = x0_ref.shape[1]
    Cmid = we_ref.shape[1]
    R = THW + 2 * W

    # Expand 1x1 (+folded BN) for the TH-row slab and its halos (halo recompute is
    # 2 rows per slab, amortized over TH).  Results concatenated in f32.
    we = we_ref[...]
    e = jnp.concatenate(
        [jnp.dot(xm_ref[0], we, preferred_element_type=jnp.float32),
         jnp.dot(x0_ref[0], we, preferred_element_type=jnp.float32),
         jnp.dot(xp_ref[0], we, preferred_element_type=jnp.float32)],
        axis=0) + be_ref[...]
    e = e * jax.nn.sigmoid(e)                                         # expand swish

    # Zero halo image-rows that fall outside the picture (SAME zero padding of e).
    r_idx = jax.lax.broadcasted_iota(jnp.int32, (R, Cmid), 0)
    valid = ((r_idx >= W) | (hb > 0)) & ((r_idx < THW + W) | (hb < nhb - 1))
    e = jnp.where(valid, e, 0.0)

    # W-direction neighbours: flat shift by +/-1 row, zeroed at image-row edges.
    # TODO(synk): pltpu.roll on the sublane axis would avoid the shift copies here.
    col = r_idx % W
    zrow = jnp.zeros((1, Cmid), jnp.float32)
    e_l = jnp.where(col == 0, 0.0, jnp.concatenate([zrow, e[:R - 1]], axis=0))
    e_r = jnp.where(col == W - 1, 0.0, jnp.concatenate([e[1:], zrow], axis=0))

    # Depthwise 3x3: tap (dy, dx) of output flat row o reads e[o + dy*W + dx - 1].
    def taps(dy):
        lo = dy * W
        return (e_l[lo:lo + THW] * wd_ref[3 * dy + 0]
                + e[lo:lo + THW] * wd_ref[3 * dy + 1]
                + e_r[lo:lo + THW] * wd_ref[3 * dy + 2])

    y = taps(0) + taps(1) + taps(2) + bd_ref[...]
    y = y * jax.nn.sigmoid(y)                                         # depthwise swish
    yb = y.astype(d_ref.dtype)
    d_ref[0] = yb

    # Fused SE squeeze: spatial sum of the exact stored (bf16-rounded) activation,
    # accumulated across the sequential row-slab axis into a resident block.
    @pl.when(hb == 0)
    def _init():
        ssum_ref[...] = jnp.zeros(ssum_ref.shape, ssum_ref.dtype)
    ssum_ref[0, 0] += jnp.sum(yb.astype(jnp.float32), axis=0)


def expand_dw_squeeze(x, h_img, w_img, we, be, wd, bd, row_cap=16):
    """x: (N, H*W, Cin) bf16; we: (Cin, Cmid) bf16; be/bd: (Cmid,) f32; wd: (9, Cmid) f32.
    Returns d: (N, H*W, Cmid) bf16 and ssum: (N, 1, Cmid) f32 (spatial sum of d)."""
    N, M, Cin = x.shape
    Cmid = we.shape[1]
    # TODO(synk): requires W (hence TH*W) to be a multiple of 8; stride-2 and 5x5
    # depthwise variants of the real EfficientNet blocks are not implemented.
    TH = _pick_th(h_img, w_img, row_cap)
    THW = TH * w_img
    nhb = h_img // TH

    main_spec = pl.BlockSpec((1, THW, Cin), lambda n, hb: (n, hb, 0))
    top_spec = pl.BlockSpec(
        (1, w_img, Cin), lambda n, hb: (n, jnp.maximum(hb * TH - 1, 0), 0))
    bot_spec = pl.BlockSpec(
        (1, w_img, Cin), lambda n, hb: (n, jnp.minimum(hb * TH + TH, h_img - 1), 0))

    # TODO(synk): for batch-1 on v7x, split the row axis 2-ways across TensorCores
    # (emit partial ssum blocks and reduce them in the SE glue).
    d, ssum = pl.pallas_call(
        functools.partial(_expand_dw_kernel, w_img=w_img),
        grid=(N, nhb),
        in_specs=[top_spec, main_spec, bot_spec,
                  pl.BlockSpec((Cin, Cmid), lambda n, hb: (0, 0)),
                  pl.BlockSpec((1, Cmid), lambda n, hb: (0, 0)),
                  pl.BlockSpec((9, Cmid), lambda n, hb: (0, 0)),
                  pl.BlockSpec((1, Cmid), lambda n, hb: (0, 0))],
        out_specs=[pl.BlockSpec((1, THW, Cmid), lambda n, hb: (n, hb, 0)),
                   pl.BlockSpec((1, 1, Cmid), lambda n, hb: (n, 0, 0))],
        out_shape=[jax.ShapeDtypeStruct((N, M, Cmid), jnp.bfloat16),
                   jax.ShapeDtypeStruct((N, 1, Cmid), jnp.float32)],
        compiler_params=pltpu.CompilerParams(
            dimension_semantics=("parallel", "arbitrary"),
            vmem_limit_bytes=_VMEM_LIMIT),
    )(x, x, x, we, be.reshape(1, Cmid), wd, bd.reshape(1, Cmid))
    return d, ssum


# --------------------------------------------------------------------------
# Kernel 3: projection 1x1 conv with the SE gate pre-folded into the per-batch
#           weight (done in glue), + bias + optional residual.
# --------------------------------------------------------------------------

def _project_kernel(x_ref, wg_ref, b_ref, *rest, has_res):
    if has_res:
        res_ref, o_ref = rest
    else:
        (o_ref,) = rest
    y = jnp.dot(x_ref[0], wg_ref[0], preferred_element_type=jnp.float32) + b_ref[...]
    if has_res:
        y = y + res_ref[0].astype(jnp.float32)
    o_ref[0] = y.astype(o_ref.dtype)


def project(x, wg, b, res, cap=256):
    """x: (N, M, Cmid) bf16; wg: (N, Cmid, Cout) bf16 (gate-folded); b: (Cout,) f32."""
    N, M, Cmid = x.shape
    Cout = wg.shape[2]
    TM, Mp = _row_tiles(M, cap)
    has_res = res is not None
    if Mp != M:
        x = jnp.pad(x, ((0, 0), (0, Mp - M), (0, 0)))
        if has_res:
            res = jnp.pad(res, ((0, 0), (0, Mp - M), (0, 0)))
    in_specs = [
        pl.BlockSpec((1, TM, Cmid), lambda n, m: (n, m, 0)),
        pl.BlockSpec((1, Cmid, Cout), lambda n, m: (n, 0, 0)),
        pl.BlockSpec((1, Cout), lambda n, m: (0, 0)),
    ]
    args = [x, wg, b.reshape(1, Cout)]
    if has_res:
        in_specs.append(pl.BlockSpec((1, TM, Cout), lambda n, m: (n, m, 0)))
        args.append(res)
    out = pl.pallas_call(
        functools.partial(_project_kernel, has_res=has_res),
        grid=(N, Mp // TM),
        in_specs=in_specs,
        out_specs=pl.BlockSpec((1, TM, Cout), lambda n, m: (n, m, 0)),
        out_shape=jax.ShapeDtypeStruct((N, Mp, Cout), jnp.bfloat16),
        compiler_params=pltpu.CompilerParams(
            dimension_semantics=("parallel", "parallel"),
            vmem_limit_bytes=_VMEM_LIMIT),
    )(*args)
    return out if Mp == M else out[:, :M]


# --------------------------------------------------------------------------
# Kernel 4: head 1x1 conv + swish fused with AdaptiveAvgPool2d(1) + flatten.
# --------------------------------------------------------------------------

def _head_gap_kernel(x_ref, w_ref, b_ref, o_ref, *, inv_m, tm, m_valid):
    m = pl.program_id(1)
    y = jnp.dot(x_ref[0], w_ref[...], preferred_element_type=jnp.float32) + b_ref[...]
    y = y * jax.nn.sigmoid(y)                    # Swish
    if m_valid is not None:                      # mask zero-padded spatial rows
        row = m * tm + jax.lax.broadcasted_iota(jnp.int32, y.shape, 0)
        y = jnp.where(row < m_valid, y, 0.0)

    @pl.when(m == 0)
    def _init():
        o_ref[...] = jnp.zeros(o_ref.shape, o_ref.dtype)
    o_ref[0, 0] += jnp.sum(y, axis=0) * inv_m    # global average pool


def head_conv_gap(x, w, b, cap=256):
    """x: (N, M, K) bf16; w: (K, Cout) bf16; b: (Cout,) f32 -> (N, Cout) f32."""
    N, M, K = x.shape
    Cout = w.shape[1]
    TM, Mp = _row_tiles(M, cap)
    m_valid = None if Mp == M else M
    if Mp != M:
        x = jnp.pad(x, ((0, 0), (0, Mp - M), (0, 0)))
    out = pl.pallas_call(
        functools.partial(_head_gap_kernel, inv_m=1.0 / M, tm=TM, m_valid=m_valid),
        grid=(N, Mp // TM),
        in_specs=[
            pl.BlockSpec((1, TM, K), lambda n, m: (n, m, 0)),
            pl.BlockSpec((K, Cout), lambda n, m: (0, 0)),
            pl.BlockSpec((1, Cout), lambda n, m: (0, 0)),
        ],
        out_specs=pl.BlockSpec((1, 1, Cout), lambda n, m: (n, 0, 0)),
        out_shape=jax.ShapeDtypeStruct((N, 1, Cout), jnp.float32),
        compiler_params=pltpu.CompilerParams(
            dimension_semantics=("parallel", "arbitrary"),
            vmem_limit_bytes=_VMEM_LIMIT),
    )(x, w, b.reshape(1, Cout))
    return out.reshape(N, Cout)


# --------------------------------------------------------------------------
# Plain-JAX glue (layout, stem im2col, BN folding, tiny SE excite, params)
# --------------------------------------------------------------------------

def im2col_3x3(x, stride):
    """x: (N, H, W, C) bf16, pad=1 -> (N, Ho*Wo, 9*C) patches (tap-major, then channel)."""
    N, H, W, C = x.shape
    Ho = (H + 2 - 3) // stride + 1
    Wo = (W + 2 - 3) // stride + 1
    xp = jnp.pad(x, ((0, 0), (1, 1), (1, 1), (0, 0)))
    taps = []
    for dy in range(3):
        for dx in range(3):
            taps.append(xp[:, dy:dy + stride * (Ho - 1) + 1:stride,
                           dx:dx + stride * (Wo - 1) + 1:stride, :])
    patches = jnp.stack(taps, axis=3)                 # (N, Ho, Wo, 9, C)
    return patches.reshape(N, Ho * Wo, 9 * C), (N, Ho, Wo)


def fold_bn(w, bn, eps=1e-3):
    """Fold eval-mode BatchNorm (gamma, beta, mean, var) into conv weights (f32)."""
    gamma, beta, mean, var = bn
    scale = gamma / jnp.sqrt(var + eps)
    return w * scale, beta - mean * scale


def init_params():
    key = jax.random.PRNGKey(0)
    keys = iter(jax.random.split(key, 128))

    def w(shape, scale=0.1):
        return scale * jax.random.normal(next(keys), shape, jnp.float32)

    def bn(c):
        return (jnp.ones((c,), jnp.float32) + 0.01 * jax.random.normal(next(keys), (c,)),
                0.01 * jax.random.normal(next(keys), (c,)),
                0.01 * jax.random.normal(next(keys), (c,)),
                jnp.ones((c,), jnp.float32) + 0.01 * jnp.abs(jax.random.normal(next(keys), (c,))))

    def mbconv_params(cin, cmid, cse, cout):
        return {
            "expand_w": w((cin, cmid)), "expand_bn": bn(cmid),
            "dw_w": w((9, cmid)),       "dw_bn": bn(cmid),
            "se_w1": w((cmid, cse)),    "se_b1": w((cse,)),
            "se_w2": w((cse, cmid)),    "se_b2": w((cmid,)),
            "proj_w": w((cmid, cout)),  "proj_bn": bn(cout),
        }

    return {
        "stem_w": w((27, 16)), "stem_bn": bn(16),     # 3x3 s2, 3 -> 16
        "block1": mbconv_params(16, 64, 4, 16),       # residual block
        "block2": mbconv_params(16, 64, 4, 24),       # channel change
        "head_w": w((24, 64)), "head_bn": bn(64),     # 1x1, 24 -> 64
    }


def mbconv(x, h_img, w_img, p, residual):
    """x: (N, H*W, Cin) bf16 -> (N, H*W, Cout) bf16 via 2 fused Pallas kernels."""
    N, M, Cin = x.shape
    we, be = fold_bn(p["expand_w"], p["expand_bn"])
    wd, bd = fold_bn(p["dw_w"], p["dw_bn"])
    d, ssum = expand_dw_squeeze(x, h_img, w_img, we.astype(jnp.bfloat16), be, wd, bd)

    # SE excite: tiny per-batch FCs done once in f32 glue (not per M tile), then
    # folded into the projection weight: (d * gate) @ Wp == d @ (gate[:, None] * Wp).
    Cmid = d.shape[-1]
    s = ssum.reshape(N, Cmid) * (1.0 / M)             # squeeze = spatial mean
    h1 = s @ p["se_w1"] + p["se_b1"]
    h1 = h1 * jax.nn.sigmoid(h1)
    gate = jax.nn.sigmoid(h1 @ p["se_w2"] + p["se_b2"])               # (N, Cmid)

    wp, bp = fold_bn(p["proj_w"], p["proj_bn"])
    Cout = wp.shape[1]
    wg = (gate[:, :, None] * wp[None, :, :]).astype(jnp.bfloat16)     # (N, Cmid, Cout)

    res = x if (residual and Cout == Cin) else None
    return project(d, wg, bp, res)


def efficientnet_backbone_forward(x_nchw, params):
    """x_nchw: (B, 3, H, W) float32 -> (B, feature_dim) float32."""
    # NCHW -> NHWC (channels on lanes), bf16 before any patch materialization.
    x = jnp.transpose(x_nchw, (0, 2, 3, 1)).astype(jnp.bfloat16)

    # Stem: conv 3x3 stride 2 (3 -> 16) + BN + swish as a tiled matmul on im2col patches.
    # TODO(synk): move the stride-2 tap gather in-kernel to avoid materializing the
    # 9x patch tensor in HBM at real resolutions.
    cols, (N, Ho, Wo) = im2col_3x3(x, stride=2)
    ws, bs = fold_bn(params["stem_w"], params["stem_bn"])
    y = conv1x1(cols, ws.astype(jnp.bfloat16), bs, act=True)          # (N, Ho*Wo, 16)

    # MBConv blocks
    y = mbconv(y, Ho, Wo, params["block1"], residual=True)
    y = mbconv(y, Ho, Wo, params["block2"], residual=False)

    # Head 1x1 conv (24 -> 64) + BN + swish fused with AdaptiveAvgPool2d(1) + view.
    wh, bh = fold_bn(params["head_w"], params["head_bn"])
    return head_conv_gap(y, wh.astype(jnp.bfloat16), bh)


if __name__ == "__main__":
    params = init_params()
    x = jax.random.normal(jax.random.PRNGKey(0), (2, 3, 16, 16), jnp.float32)  # NCHW
    fwd = jax.jit(lambda inp: efficientnet_backbone_forward(inp, params))
    out = fwd(x)
    jax.block_until_ready(out)
    assert out.shape == (2, 64) and out.dtype == jnp.float32
    print("KERNEL_OK")
</pallas_src>

<mosaic_0001>
module attributes {stable_mosaic.version = 11 : i64} {
  func.func @_conv1x1_kernel(%arg0: i32, %arg1: i32, %arg2: memref<1x64x27xbf16, #tpu.memory_space<vmem>>, %arg3: memref<27x16xbf16, #tpu.memory_space<vmem>>, %arg4: memref<1x16xf32, #tpu.memory_space<vmem>>, %arg5: memref<1x64x16xbf16, #tpu.memory_space<vmem>>) attributes {dimension_semantics = [#tpu.dimension_semantics<parallel>, #tpu.dimension_semantics<parallel>], iteration_bounds = array<i64: 2, 1>, scalar_prefetch = 0 : i64, scratch_operands = 0 : i64, tpu.core_type = #tpu.core_type<tc>, window_params = [{transform_indices = @transform_0, window_bounds = array<i64: 1, 64, 27>}, {pipeline_mode = #tpu.pipeline_mode<synchronous>, transform_indices = @transform_1, window_bounds = array<i64: 27, 16>}, {pipeline_mode = #tpu.pipeline_mode<synchronous>, transform_indices = @transform_2, window_bounds = array<i64: 1, 16>}, {transform_indices = @transform_3, window_bounds = array<i64: 1, 64, 16>}]} {
    %c0 = arith.constant 0 : index
    %c0_0 = arith.constant 0 : index
    %c0_1 = arith.constant 0 : index
    %0 = vector.load %arg2[%c0, %c0_0, %c0_1] : memref<1x64x27xbf16, #tpu.memory_space<vmem>>, vector<1x64x27xbf16>
    %1 = vector.shape_cast %0 : vector<1x64x27xbf16> to vector<64x27xbf16>
    %c0_2 = arith.constant 0 : index
    %c0_3 = arith.constant 0 : index
    %2 = vector.load %arg3[%c0_2, %c0_3] : memref<27x16xbf16, #tpu.memory_space<vmem>>, vector<27x16xbf16>
    %cst = arith.constant dense<0.000000e+00> : vector<64x16xf32>
    %3 = tpu.matmul %1, %2, %cst {dimension_numbers = #tpu.dot_dimension_numbers<[1], [0], [0], [1], [0, 0, 1, 1], [], []>} : vector<64x27xbf16>, vector<27x16xbf16>, vector<64x16xf32> -> vector<64x16xf32>
    %c0_4 = arith.constant 0 : index
    %c0_5 = arith.constant 0 : index
    %4 = vector.load %arg4[%c0_4, %c0_5] : memref<1x16xf32, #tpu.memory_space<vmem>>, vector<1x16xf32>
    %5 = vector.broadcast %4 : vector<1x16xf32> to vector<64x16xf32>
    %6 = arith.addf %3, %5 : vector<64x16xf32>
    %7 = arith.negf %6 : vector<64x16xf32>
    %8 = math.exp %7 : vector<64x16xf32>
    %cst_6 = arith.constant 1.000000e+00 : f32
    %9 = vector.broadcast %cst_6 : f32 to vector<64x16xf32>
    %10 = arith.addf %9, %8 : vector<64x16xf32>
    %11 = arith.divf %9, %10 : vector<64x16xf32>
    %12 = arith.mulf %6, %11 : vector<64x16xf32>
    %13 = arith.truncf %12 : vector<64x16xf32> to vector<64x16xbf16>
    %c0_7 = arith.constant 0 : index
    %c0_8 = arith.constant 0 : index
    %c0_9 = arith.constant 0 : index
    %14 = vector.load %arg5[%c0_7, %c0_8, %c0_9] : memref<1x64x16xbf16, #tpu.memory_space<vmem>>, vector<1x64x16xbf16>
    %15 = vector.shape_cast %14 : vector<1x64x16xbf16> to vector<64x16xbf16>
    %16 = vector.shape_cast %13 : vector<64x16xbf16> to vector<1x64x16xbf16>
    tpu.vector_store %arg5[%c0_7, %c0_8, %c0_9], %16 {strides = array<i32>} : memref<1x64x16xbf16, #tpu.memory_space<vmem>>, vector<1x64x16xbf16>,
    return
  }
  func.func @transform_0(%arg0: i32, %arg1: i32) -> (i32, i32, i32) {
    %c0_i32 = arith.constant 0 : i32
    %c0_i32_0 = arith.constant 0 : i32
    return %arg0, %arg1, %c0_i32 : i32, i32, i32
  }
  func.func @transform_1(%arg0: i32, %arg1: i32) -> (i32, i32) {
    %c0_i32 = arith.constant 0 : i32
    %c0_i32_0 = arith.constant 0 : i32
    %c0_i32_1 = arith.constant 0 : i32
    return %c0_i32, %c0_i32_0 : i32, i32
  }
  func.func @transform_2(%arg0: i32, %arg1: i32) -> (i32, i32) {
    %c0_i32 = arith.constant 0 : i32
    %c0_i32_0 = arith.constant 0 : i32
    %c0_i32_1 = arith.constant 0 : i32
    return %c0_i32, %c0_i32_0 : i32, i32
  }
  func.func @transform_3(%arg0: i32, %arg1: i32) -> (i32, i32, i32) {
    %c0_i32 = arith.constant 0 : i32
    %c0_i32_0 = arith.constant 0 : i32
    return %arg0, %arg1, %c0_i32 : i32, i32, i32
  }
}

module attributes {stable_mosaic.version = 11 : i64} {
  func.func @_expand_dw_kernel(%arg0: i32, %arg1: i32, %arg2: memref<1x8x16xbf16, #tpu.memory_space<vmem>>, %arg3: memref<1x64x16xbf16, #tpu.memory_space<vmem>>, %arg4: memref<1x8x16xbf16, #tpu.memory_space<vmem>>, %arg5: memref<16x64xbf16, #tpu.memory_space<vmem>>, %arg6: memref<1x64xf32, #tpu.memory_space<vmem>>, %arg7: memref<9x64xf32, #tpu.memory_space<vmem>>, %arg8: memref<1x64xf32, #tpu.memory_space<vmem>>, %arg9: memref<1x64x64xbf16, #tpu.memory_space<vmem>>, %arg10: memref<1x1x64xf32, #tpu.memory_space<vmem>>) attributes {dimension_semantics = [#tpu.dimension_semantics<parallel>, #tpu.dimension_semantics<arbitrary>], iteration_bounds = array<i64: 2, 1>, scalar_prefetch = 0 : i64, scratch_operands = 0 : i64, tpu.core_type = #tpu.core_type<tc>, window_params = [{transform_indices = @transform_0, window_bounds = array<i64: 1, 8, 16>}, {transform_indices = @transform_1, window_bounds = array<i64: 1, 64, 16>}, {transform_indices = @transform_2, window_bounds = array<i64: 1, 8, 16>}, {pipeline_mode = #tpu.pipeline_mode<synchronous>, transform_indices = @transform_3, window_bounds = array<i64: 16, 64>}, {pipeline_mode = #tpu.pipeline_mode<synchronous>, transform_indices = @transform_4, window_bounds = array<i64: 1, 64>}, {pipeline_mode = #tpu.pipeline_mode<synchronous>, transform_indices = @transform_5, window_bounds = array<i64: 9, 64>}, {pipeline_mode = #tpu.pipeline_mode<synchronous>, transform_indices = @transform_6, window_bounds = array<i64: 1, 64>}, {transform_indices = @transform_7, window_bounds = array<i64: 1, 64, 64>}, {transform_indices = @transform_8, window_bounds = array<i64: 1, 1, 64>}]} {
    %c0 = arith.constant 0 : index
    %c0_0 = arith.constant 0 : index
    %0 = vector.load %arg5[%c0, %c0_0] : memref<16x64xbf16, #tpu.memory_space<vmem>>, vector<16x64xbf16>
    %c0_1 = arith.constant 0 : index
    %c0_2 = arith.constant 0 : index
    %c0_3 = arith.constant 0 : index
    %1 = vector.load %arg2[%c0_1, %c0_2, %c0_3] : memref<1x8x16xbf16, #tpu.memory_space<vmem>>, vector<1x8x16xbf16>
    %2 = vector.shape_cast %1 : vector<1x8x16xbf16> to vector<8x16xbf16>
    %cst = arith.constant dense<0.000000e+00> : vector<8x64xf32>
    %3 = tpu.matmul %2, %0, %cst {dimension_numbers = #tpu.dot_dimension_numbers<[1], [0], [0], [1], [0, 0, 1, 1], [], []>} : vector<8x16xbf16>, vector<16x64xbf16>, vector<8x64xf32> -> vector<8x64xf32>
    %c0_4 = arith.constant 0 : index
    %c0_5 = arith.constant 0 : index
    %c0_6 = arith.constant 0 : index
    %4 = vector.load %arg3[%c0_4, %c0_5, %c0_6] : memref<1x64x16xbf16, #tpu.memory_space<vmem>>, vector<1x64x16xbf16>
    %5 = vector.shape_cast %4 : vector<1x64x16xbf16> to vector<64x16xbf16>
    %cst_7 = arith.constant dense<0.000000e+00> : vector<64x64xf32>
    %6 = tpu.matmul %5, %0, %cst_7 {dimension_numbers = #tpu.dot_dimension_numbers<[1], [0], [0], [1], [0, 0, 1, 1], [], []>} : vector<64x16xbf16>, vector<16x64xbf16>, vector<64x64xf32> -> vector<64x64xf32>
    %c0_8 = arith.constant 0 : index
    %c0_9 = arith.constant 0 : index
    %c0_10 = arith.constant 0 : index
    %7 = vector.load %arg4[%c0_8, %c0_9, %c0_10] : memref<1x8x16xbf16, #tpu.memory_space<vmem>>, vector<1x8x16xbf16>
    %8 = vector.shape_cast %7 : vector<1x8x16xbf16> to vector<8x16xbf16>
    %cst_11 = arith.constant dense<0.000000e+00> : vector<8x64xf32>
    %9 = tpu.matmul %8, %0, %cst_11 {dimension_numbers = #tpu.dot_dimension_numbers<[1], [0], [0], [1], [0, 0, 1, 1], [], []>} : vector<8x16xbf16>, vector<16x64xbf16>, vector<8x64xf32> -> vector<8x64xf32>
    %10 = tpu.concatenate %3, %6, %9 in 0 : vector<8x64xf32>, vector<64x64xf32>, vector<8x64xf32> -> vector<80x64xf32>
    %c0_12 = arith.constant 0 : index
    %c0_13 = arith.constant 0 : index
    %11 = vector.load %arg6[%c0_12, %c0_13] : memref<1x64xf32, #tpu.memory_space<vmem>>, vector<1x64xf32>
    %12 = vector.broadcast %11 : vector<1x64xf32> to vector<80x64xf32>
    %13 = arith.addf %10, %12 : vector<80x64xf32>
    %14 = arith.negf %13 : vector<80x64xf32>
    %15 = math.exp %14 : vector<80x64xf32>
    %cst_14 = arith.constant 1.000000e+00 : f32
    %16 = vector.broadcast %cst_14 : f32 to vector<80x64xf32>
    %17 = arith.addf %16, %15 : vector<80x64xf32>
    %18 = arith.divf %16, %17 : vector<80x64xf32>
    %19 = arith.mulf %13, %18 : vector<80x64xf32>
    %20 = tpu.iota {dimensions = array<i32: 0>} : vector<80x64xi32>
    %c8_i32 = arith.constant 8 : i32
    %21 = vector.broadcast %c8_i32 : i32 to vector<80x64xi32>
    %22 = arith.cmpi sge, %20, %21 : vector<80x64xi32>
    %c0_i32 = arith.constant 0 : i32
    %23 = arith.cmpi sgt, %arg1, %c0_i32 : i32
    %24 = vector.broadcast %23 : i1 to vector<80x64xi1>
    %25 = arith.ori %22, %24 : vector<80x64xi1>
    %c72_i32 = arith.constant 72 : i32
    %26 = vector.broadcast %c72_i32 : i32 to vector<80x64xi32>
    %27 = arith.cmpi slt, %20, %26 : vector<80x64xi32>
    %c0_i32_15 = arith.constant 0 : i32
    %28 = arith.cmpi slt, %arg1, %c0_i32_15 : i32
    %29 = vector.broadcast %28 : i1 to vector<80x64xi1>
    %30 = arith.ori %27, %29 : vector<80x64xi1>
    %31 = arith.andi %25, %30 : vector<80x64xi1>
    %cst_16 = arith.constant 0.000000e+00 : f32
    %32 = vector.broadcast %cst_16 : f32 to vector<80x64xf32>
    %33 = arith.select %31, %19, %32 : vector<80x64xi1>, vector<80x64xf32>
    %c8_i32_17 = arith.constant 8 : i32
    %c0_i32_18 = arith.constant 0 : i32
    %34 = arith.cmpi eq, %c8_i32_17, %c0_i32_18 : i32
    %c1_i32 = arith.constant 1 : i32
    %35 = arith.select %34, %c1_i32, %c8_i32_17 : i32
    %36 = vector.broadcast %35 : i32 to vector<80x64xi32>
    %37 = arith.remsi %20, %36 : vector<80x64xi32>
    %c0_i32_19 = arith.constant 0 : i32
    %38 = vector.broadcast %c0_i32_19 : i32 to vector<80x64xi32>
    %39 = arith.cmpi ne, %37, %38 : vector<80x64xi32>
    %c0_i32_20 = arith.constant 0 : i32
    %40 = vector.broadcast %c0_i32_20 : i32 to vector<80x64xi32>
    %41 = arith.cmpi slt, %37, %40 : vector<80x64xi32>
    %c0_i32_21 = arith.constant 0 : i32
    %42 = arith.cmpi slt, %35, %c0_i32_21 : i32
    %43 = vector.broadcast %42 : i1 to vector<80x64xi1>
    %44 = vector.broadcast %43 : vector<80x64xi1> to vector<80x64xi1>
    %45 = arith.xori %41, %44 : vector<80x64xi1>
    %46 = arith.andi %45, %39 : vector<80x64xi1>
    %47 = vector.broadcast %35 : i32 to vector<80x64xi32>
    %48 = arith.addi %37, %47 : vector<80x64xi32>
    %49 = arith.select %46, %48, %37 : vector<80x64xi1>, vector<80x64xi32>
    %cst_22 = arith.constant 0.000000e+00 : f32
    %50 = vector.broadcast %cst_22 : f32 to vector<1x64xf32>
    %c0_i32_23 = arith.constant 0 : i32
    %51 = vector.broadcast %c0_i32_23 : i32 to vector<80x64xi32>
    %52 = arith.cmpi eq, %49, %51 : vector<80x64xi32>
    %53 = vector.extract_strided_slice %33 {offsets = [0, 0], sizes = [79, 64], strides = [1, 1]} : vector<80x64xf32> to vector<79x64xf32>
    %54 = tpu.concatenate %50, %53 in 0 : vector<1x64xf32>, vector<79x64xf32> -> vector<80x64xf32>
    %cst_24 = arith.constant 0.000000e+00 : f32
    %55 = vector.broadcast %cst_24 : f32 to vector<80x64xf32>
    %56 = arith.select %52, %55, %54 : vector<80x64xi1>, vector<80x64xf32>
    %c7_i32 = arith.constant 7 : i32
    %57 = vector.broadcast %c7_i32 : i32 to vector<80x64xi32>
    %58 = arith.cmpi eq, %49, %57 : vector<80x64xi32>
    %59 = vector.extract_strided_slice %33 {offsets = [1, 0], sizes = [79, 64], strides = [1, 1]} : vector<80x64xf32> to vector<79x64xf32>
    %60 = tpu.concatenate %59, %50 in 0 : vector<79x64xf32>, vector<1x64xf32> -> vector<80x64xf32>
    %cst_25 = arith.constant 0.000000e+00 : f32
    %61 = vector.broadcast %cst_25 : f32 to vector<80x64xf32>
    %62 = arith.select %58, %61, %60 : vector<80x64xi1>, vector<80x64xf32>
    %63 = vector.extract_strided_slice %56 {offsets = [0, 0], sizes = [64, 64], strides = [1, 1]} : vector<80x64xf32> to vector<64x64xf32>
    %c0_26 = arith.constant 0 : index
    %c0_27 = arith.constant 0 : index
    %64 = vector.load %arg7[%c0_26, %c0_27] : memref<9x64xf32, #tpu.memory_space<vmem>>, vector<1x64xf32>
    %65 = vector.shape_cast %64 : vector<1x64xf32> to vector<64xf32>
    %66 = vector.shape_cast %65 : vector<64xf32> to vector<1x64xf32>
    %67 = vector.broadcast %66 : vector<1x64xf32> to vector<64x64xf32>
    %68 = arith.mulf %63, %67 : vector<64x64xf32>
    %69 = vector.extract_strided_slice %33 {offsets = [0, 0], sizes = [64, 64], strides = [1, 1]} : vector<80x64xf32> to vector<64x64xf32>
    %c1 = arith.constant 1 : index
    %c0_28 = arith.constant 0 : index
    %70 = vector.load %arg7[%c1, %c0_28] : memref<9x64xf32, #tpu.memory_space<vmem>>, vector<1x64xf32>
    %71 = vector.shape_cast %70 : vector<1x64xf32> to vector<64xf32>
    %72 = vector.shape_cast %71 : vector<64xf32> to vector<1x64xf32>
    %73 = vector.broadcast %72 : vector<1x64xf32> to vector<64x64xf32>
    %74 = arith.mulf %69, %73 : vector<64x64xf32>
    %75 = arith.addf %68, %74 : vector<64x64xf32>
    %76 = vector.extract_strided_slice %62 {offsets = [0, 0], sizes = [64, 64], strides = [1, 1]} : vector<80x64xf32> to vector<64x64xf32>
    %c2 = arith.constant 2 : index
    %c0_29 = arith.constant 0 : index
    %77 = vector.load %arg7[%c2, %c0_29] : memref<9x64xf32, #tpu.memory_space<vmem>>, vector<1x64xf32>
    %78 = vector.shape_cast %77 : vector<1x64xf32> to vector<64xf32>
    %79 = vector.shape_cast %78 : vector<64xf32> to vector<1x64xf32>
    %80 = vector.broadcast %79 : vector<1x64xf32> to vector<64x64xf32>
    %81 = arith.mulf %76, %80 : vector<64x64xf32>
    %82 = arith.addf %75, %81 : vector<64x64xf32>
    %83 = vector.extract_strided_slice %56 {offsets = [8, 0], sizes = [64, 64], strides = [1, 1]} : vector<80x64xf32> to vector<64x64xf32>
    %c3 = arith.constant 3 : index
    %c0_30 = arith.constant 0 : index
    %84 = vector.load %arg7[%c3, %c0_30] : memref<9x64xf32, #tpu.memory_space<vmem>>, vector<1x64xf32>
    %85 = vector.shape_cast %84 : vector<1x64xf32> to vector<64xf32>
    %86 = vector.shape_cast %85 : vector<64xf32> to vector<1x64xf32>
    %87 = vector.broadcast %86 : vector<1x64xf32> to vector<64x64xf32>
    %88 = arith.mulf %83, %87 : vector<64x64xf32>
    %89 = vector.extract_strided_slice %33 {offsets = [8, 0], sizes = [64, 64], strides = [1, 1]} : vector<80x64xf32> to vector<64x64xf32>
    %c4 = arith.constant 4 : index
    %c0_31 = arith.constant 0 : index
    %90 = vector.load %arg7[%c4, %c0_31] : memref<9x64xf32, #tpu.memory_space<vmem>>, vector<1x64xf32>
    %91 = vector.shape_cast %90 : vector<1x64xf32> to vector<64xf32>
    %92 = vector.shape_cast %91 : vector<64xf32> to vector<1x64xf32>
    %93 = vector.broadcast %92 : vector<1x64xf32> to vector<64x64xf32>
    %94 = arith.mulf %89, %93 : vector<64x64xf32>
    %95 = arith.addf %88, %94 : vector<64x64xf32>
    %96 = vector.extract_strided_slice %62 {offsets = [8, 0], sizes = [64, 64], strides = [1, 1]} : vector<80x64xf32> to vector<64x64xf32>
    %c5 = arith.constant 5 : index
    %c0_32 = arith.constant 0 : index
    %97 = vector.load %arg7[%c5, %c0_32] : memref<9x64xf32, #tpu.memory_space<vmem>>, vector<1x64xf32>
    %98 = vector.shape_cast %97 : vector<1x64xf32> to vector<64xf32>
    %99 = vector.shape_cast %98 : vector<64xf32> to vector<1x64xf32>
    %100 = vector.broadcast %99 : vector<1x64xf32> to vector<64x64xf32>
    %101 = arith.mulf %96, %100 : vector<64x64xf32>
    %102 = arith.addf %95, %101 : vector<64x64xf32>
    %103 = arith.addf %82, %102 : vector<64x64xf32>
    %104 = vector.extract_strided_slice %56 {offsets = [16, 0], sizes = [64, 64], strides = [1, 1]} : vector<80x64xf32> to vector<64x64xf32>
    %c6 = arith.constant 6 : index
    %c0_33 = arith.constant 0 : index
    %105 = vector.load %arg7[%c6, %c0_33] : memref<9x64xf32, #tpu.memory_space<vmem>>, vector<1x64xf32>
    %106 = vector.shape_cast %105 : vector<1x64xf32> to vector<64xf32>
    %107 = vector.shape_cast %106 : vector<64xf32> to vector<1x64xf32>
    %108 = vector.broadcast %107 : vector<1x64xf32> to vector<64x64xf32>
    %109 = arith.mulf %104, %108 : vector<64x64xf32>
    %110 = vector.extract_strided_slice %33 {offsets = [16, 0], sizes = [64, 64], strides = [1, 1]} : vector<80x64xf32> to vector<64x64xf32>
    %c7 = arith.constant 7 : index
    %c0_34 = arith.constant 0 : index
    %111 = vector.load %arg7[%c7, %c0_34] : memref<9x64xf32, #tpu.memory_space<vmem>>, vector<1x64xf32>
    %112 = vector.shape_cast %111 : vector<1x64xf32> to vector<64xf32>
    %113 = vector.shape_cast %112 : vector<64xf32> to vector<1x64xf32>
    %114 = vector.broadcast %113 : vector<1x64xf32> to vector<64x64xf32>
    %115 = arith.mulf %110, %114 : vector<64x64xf32>
    %116 = arith.addf %109, %115 : vector<64x64xf32>
    %117 = vector.extract_strided_slice %62 {offsets = [16, 0], sizes = [64, 64], strides = [1, 1]} : vector<80x64xf32> to vector<64x64xf32>
    %c8 = arith.constant 8 : index
    %c0_35 = arith.constant 0 : index
    %118 = vector.load %arg7[%c8, %c0_35] : memref<9x64xf32, #tpu.memory_space<vmem>>, vector<1x64xf32>
    %119 = vector.shape_cast %118 : vector<1x64xf32> to vector<64xf32>
    %120 = vector.shape_cast %119 : vector<64xf32> to vector<1x64xf32>
    %121 = vector.broadcast %120 : vector<1x64xf32> to vector<64x64xf32>
    %122 = arith.mulf %117, %121 : vector<64x64xf32>
    %123 = arith.addf %116, %122 : vector<64x64xf32>
    %124 = arith.addf %103, %123 : vector<64x64xf32>
    %c0_36 = arith.constant 0 : index
    %c0_37 = arith.constant 0 : index
    %125 = vector.load %arg8[%c0_36, %c0_37] : memref<1x64xf32, #tpu.memory_space<vmem>>, vector<1x64xf32>
    %126 = vector.broadcast %125 : vector<1x64xf32> to vector<64x64xf32>
    %127 = arith.addf %124, %126 : vector<64x64xf32>
    %128 = arith.negf %127 : vector<64x64xf32>
    %129 = math.exp %128 : vector<64x64xf32>
    %cst_38 = arith.constant 1.000000e+00 : f32
    %130 = vector.broadcast %cst_38 : f32 to vector<64x64xf32>
    %131 = arith.addf %130, %129 : vector<64x64xf32>
    %132 = arith.divf %130, %131 : vector<64x64xf32>
    %133 = arith.mulf %127, %132 : vector<64x64xf32>
    %134 = arith.truncf %133 : vector<64x64xf32> to vector<64x64xbf16>
    %c0_39 = arith.constant 0 : index
    %c0_40 = arith.constant 0 : index
    %c0_41 = arith.constant 0 : index
    %135 = vector.load %arg9[%c0_39, %c0_40, %c0_41] : memref<1x64x64xbf16, #tpu.memory_space<vmem>>, vector<1x64x64xbf16>
    %136 = vector.shape_cast %135 : vector<1x64x64xbf16> to vector<64x64xbf16>
    %137 = vector.shape_cast %134 : vector<64x64xbf16> to vector<1x64x64xbf16>
    tpu.vector_store %arg9[%c0_39, %c0_40, %c0_41], %137 {strides = array<i32>} : memref<1x64x64xbf16, #tpu.memory_space<vmem>>, vector<1x64x64xbf16>,
    %c0_i32_42 = arith.constant 0 : i32
    %138 = arith.cmpi eq, %arg1, %c0_i32_42 : i32
    %139 = arith.extui %138 : i1 to i32
    %c0_i32_43 = arith.constant 0 : i32
    %140 = arith.cmpi ne, %139, %c0_i32_43 : i32
    scf.if %140 {
      %cst_51 = arith.constant 0.000000e+00 : f32
      %149 = vector.broadcast %cst_51 : f32 to vector<1x1x64xf32>
      %c0_52 = arith.constant 0 : index
      %c0_53 = arith.constant 0 : index
      %c0_54 = arith.constant 0 : index
      %150 = vector.load %arg10[%c0_52, %c0_53, %c0_54] : memref<1x1x64xf32, #tpu.memory_space<vmem>>, vector<1x1x64xf32>
      tpu.vector_store %arg10[%c0_52, %c0_53, %c0_54], %149 {strides = array<i32>} : memref<1x1x64xf32, #tpu.memory_space<vmem>>, vector<1x1x64xf32>,
    } else {
    }
    %c0_44 = arith.constant 0 : index
    %c0_45 = arith.constant 0 : index
    %c0_46 = arith.constant 0 : index
    %141 = vector.load %arg10[%c0_44, %c0_45, %c0_46] : memref<1x1x64xf32, #tpu.memory_space<vmem>>, vector<1x1x64xf32>
    %142 = vector.shape_cast %141 : vector<1x1x64xf32> to vector<64xf32>
    %143 = arith.extf %134 : vector<64x64xbf16> to vector<64x64xf32>
    %cst_47 = arith.constant dense<0.000000e+00> : vector<64xf32>
    %144 = vector.multi_reduction <add>, %143, %cst_47 [0] : vector<64x64xf32> to vector<64xf32>
    %145 = arith.addf %142, %144 : vector<64xf32>
    %c0_48 = arith.constant 0 : index
    %c0_49 = arith.constant 0 : index
    %c0_50 = arith.constant 0 : index
    %146 = vector.load %arg10[%c0_48, %c0_49, %c0_50] : memref<1x1x64xf32, #tpu.memory_space<vmem>>, vector<1x1x64xf32>
    %147 = vector.shape_cast %146 : vector<1x1x64xf32> to vector<64xf32>
    %148 = vector.shape_cast %145 : vector<64xf32> to vector<1x1x64xf32>
    tpu.vector_store %arg10[%c0_48, %c0_49, %c0_50], %148 {strides = array<i32>} : memref<1x1x64xf32, #tpu.memory_space<vmem>>, vector<1x1x64xf32>,
    return
  }
  func.func @transform_0(%arg0: i32, %arg1: i32) -> (i32, i32, i32) {
    %c8_i32 = arith.constant 8 : i32
    %0 = arith.muli %arg1, %c8_i32 : i32
    %c1_i32 = arith.constant 1 : i32
    %1 = arith.subi %0, %c1_i32 : i32
    %c0_i32 = arith.constant 0 : i32
    %2 = arith.maxsi %1, %c0_i32 : i32
    %c0_i32_0 = arith.constant 0 : i32
    %c0_i32_1 = arith.constant 0 : i32
    return %arg0, %2, %c0_i32_0 : i32, i32, i32
  }
  func.func @transform_1(%arg0: i32, %arg1: i32) -> (i32, i32, i32) {
    %c0_i32 = arith.constant 0 : i32
    %c0_i32_0 = arith.constant 0 : i32
    return %arg0, %arg1, %c0_i32 : i32, i32, i32
  }
  func.func @transform_2(%arg0: i32, %arg1: i32) -> (i32, i32, i32) {
    %c8_i32 = arith.constant 8 : i32
    %0 = arith.muli %arg1, %c8_i32 : i32
    %c8_i32_0 = arith.constant 8 : i32
    %1 = arith.addi %0, %c8_i32_0 : i32
    %c7_i32 = arith.constant 7 : i32
    %2 = arith.minsi %1, %c7_i32 : i32
    %c0_i32 = arith.constant 0 : i32
    %c0_i32_1 = arith.constant 0 : i32
    return %arg0, %2, %c0_i32 : i32, i32, i32
  }
  func.func @transform_3(%arg0: i32, %arg1: i32) -> (i32, i32) {
    %c0_i32 = arith.constant 0 : i32
    %c0_i32_0 = arith.constant 0 : i32
    %c0_i32_1 = arith.constant 0 : i32
    return %c0_i32, %c0_i32_0 : i32, i32
  }
  func.func @transform_4(%arg0: i32, %arg1: i32) -> (i32, i32) {
    %c0_i32 = arith.constant 0 : i32
    %c0_i32_0 = arith.constant 0 : i32
    %c0_i32_1 = arith.constant 0 : i32
    return %c0_i32, %c0_i32_0 : i32, i32
  }
  func.func @transform_5(%arg0: i32, %arg1: i32) -> (i32, i32) {
    %c0_i32 = arith.constant 0 : i32
    %c0_i32_0 = arith.constant 0 : i32
    %c0_i32_1 = arith.constant 0 : i32
    return %c0_i32, %c0_i32_0 : i32, i32
  }
  func.func @transform_6(%arg0: i32, %arg1: i32) -> (i32, i32) {
    %c0_i32 = arith.constant 0 : i32
    %c0_i32_0 = arith.constant 0 : i32
    %c0_i32_1 = arith.constant 0 : i32
    return %c0_i32, %c0_i32_0 : i32, i32
  }
  func.func @transform_7(%arg0: i32, %arg1: i32) -> (i32, i32, i32) {
    %c0_i32 = arith.constant 0 : i32
    %c0_i32_0 = arith.constant 0 : i32
    return %arg0, %arg1, %c0_i32 : i32, i32, i32
  }
  func.func @transform_8(%arg0: i32, %arg1: i32) -> (i32, i32, i32) {
    %c0_i32 = arith.constant 0 : i32
    %c0_i32_0 = arith.constant 0 : i32
    %c0_i32_1 = arith.constant 0 : i32
    return %arg0, %c0_i32, %c0_i32_0 : i32, i32, i32
  }
}

module attributes {stable_mosaic.version = 11 : i64} {
  func.func @_project_kernel(%arg0: i32, %arg1: i32, %arg2: memref<1x64x64xbf16, #tpu.memory_space<vmem>>, %arg3: memref<1x64x16xbf16, #tpu.memory_space<vmem>>, %arg4: memref<1x16xf32, #tpu.memory_space<vmem>>, %arg5: memref<1x64x16xbf16, #tpu.memory_space<vmem>>, %arg6: memref<1x64x16xbf16, #tpu.memory_space<vmem>>) attributes {dimension_semantics = [#tpu.dimension_semantics<parallel>, #tpu.dimension_semantics<parallel>], iteration_bounds = array<i64: 2, 1>, scalar_prefetch = 0 : i64, scratch_operands = 0 : i64, tpu.core_type = #tpu.core_type<tc>, window_params = [{transform_indices = @transform_0, window_bounds = array<i64: 1, 64, 64>}, {transform_indices = @transform_1, window_bounds = array<i64: 1, 64, 16>}, {pipeline_mode = #tpu.pipeline_mode<synchronous>, transform_indices = @transform_2, window_bounds = array<i64: 1, 16>}, {transform_indices = @transform_3, window_bounds = array<i64: 1, 64, 16>}, {transform_indices = @transform_4, window_bounds = array<i64: 1, 64, 16>}]} {
    %c0 = arith.constant 0 : index
    %c0_0 = arith.constant 0 : index
    %c0_1 = arith.constant 0 : index
    %0 = vector.load %arg2[%c0, %c0_0, %c0_1] : memref<1x64x64xbf16, #tpu.memory_space<vmem>>, vector<1x64x64xbf16>
    %1 = vector.shape_cast %0 : vector<1x64x64xbf16> to vector<64x64xbf16>
    %c0_2 = arith.constant 0 : index
    %c0_3 = arith.constant 0 : index
    %c0_4 = arith.constant 0 : index
    %2 = vector.load %arg3[%c0_2, %c0_3, %c0_4] : memref<1x64x16xbf16, #tpu.memory_space<vmem>>, vector<1x64x16xbf16>
    %3 = vector.shape_cast %2 : vector<1x64x16xbf16> to vector<64x16xbf16>
    %cst = arith.constant dense<0.000000e+00> : vector<64x16xf32>
    %4 = tpu.matmul %1, %3, %cst {dimension_numbers = #tpu.dot_dimension_numbers<[1], [0], [0], [1], [0, 0, 1, 1], [], []>} : vector<64x64xbf16>, vector<64x16xbf16>, vector<64x16xf32> -> vector<64x16xf32>
    %c0_5 = arith.constant 0 : index
    %c0_6 = arith.constant 0 : index
    %5 = vector.load %arg4[%c0_5, %c0_6] : memref<1x16xf32, #tpu.memory_space<vmem>>, vector<1x16xf32>
    %6 = vector.broadcast %5 : vector<1x16xf32> to vector<64x16xf32>
    %7 = arith.addf %4, %6 : vector<64x16xf32>
    %c0_7 = arith.constant 0 : index
    %c0_8 = arith.constant 0 : index
    %c0_9 = arith.constant 0 : index
    %8 = vector.load %arg5[%c0_7, %c0_8, %c0_9] : memref<1x64x16xbf16, #tpu.memory_space<vmem>>, vector<1x64x16xbf16>
    %9 = vector.shape_cast %8 : vector<1x64x16xbf16> to vector<64x16xbf16>
    %10 = arith.extf %9 : vector<64x16xbf16> to vector<64x16xf32>
    %11 = arith.addf %7, %10 : vector<64x16xf32>
    %12 = arith.truncf %11 : vector<64x16xf32> to vector<64x16xbf16>
    %c0_10 = arith.constant 0 : index
    %c0_11 = arith.constant 0 : index
    %c0_12 = arith.constant 0 : index
    %13 = vector.load %arg6[%c0_10, %c0_11, %c0_12] : memref<1x64x16xbf16, #tpu.memory_space<vmem>>, vector<1x64x16xbf16>
    %14 = vector.shape_cast %13 : vector<1x64x16xbf16> to vector<64x16xbf16>
    %15 = vector.shape_cast %12 : vector<64x16xbf16> to vector<1x64x16xbf16>
    tpu.vector_store %arg6[%c0_10, %c0_11, %c0_12], %15 {strides = array<i32>} : memref<1x64x16xbf16, #tpu.memory_space<vmem>>, vector<1x64x16xbf16>,
    return
  }
  func.func @transform_0(%arg0: i32, %arg1: i32) -> (i32, i32, i32) {
    %c0_i32 = arith.constant 0 : i32
    %c0_i32_0 = arith.constant 0 : i32
    return %arg0, %arg1, %c0_i32 : i32, i32, i32
  }
  func.func @transform_1(%arg0: i32, %arg1: i32) -> (i32, i32, i32) {
    %c0_i32 = arith.constant 0 : i32
    %c0_i32_0 = arith.constant 0 : i32
    %c0_i32_1 = arith.constant 0 : i32
    return %arg0, %c0_i32, %c0_i32_0 : i32, i32, i32
  }
  func.func @transform_2(%arg0: i32, %arg1: i32) -> (i32, i32) {
    %c0_i32 = arith.constant 0 : i32
    %c0_i32_0 = arith.constant 0 : i32
    %c0_i32_1 = arith.constant 0 : i32
    return %c0_i32, %c0_i32_0 : i32, i32
  }
  func.func @transform_3(%arg0: i32, %arg1: i32) -> (i32, i32, i32) {
    %c0_i32 = arith.constant 0 : i32
    %c0_i32_0 = arith.constant 0 : i32
    return %arg0, %arg1, %c0_i32 : i32, i32, i32
  }
  func.func @transform_4(%arg0: i32, %arg1: i32) -> (i32, i32, i32) {
    %c0_i32 = arith.constant 0 : i32
    %c0_i32_0 = arith.constant 0 : i32
    return %arg0, %arg1, %c0_i32 : i32, i32, i32
  }
}

module attributes {stable_mosaic.version = 11 : i64} {
  func.func @_project_kernel(%arg0: i32, %arg1: i32, %arg2: memref<1x64x64xbf16, #tpu.memory_space<vmem>>, %arg3: memref<1x64x24xbf16, #tpu.memory_space<vmem>>, %arg4: memref<1x24xf32, #tpu.memory_space<vmem>>, %arg5: memref<1x64x24xbf16, #tpu.memory_space<vmem>>) attributes {dimension_semantics = [#tpu.dimension_semantics<parallel>, #tpu.dimension_semantics<parallel>], iteration_bounds = array<i64: 2, 1>, scalar_prefetch = 0 : i64, scratch_operands = 0 : i64, tpu.core_type = #tpu.core_type<tc>, window_params = [{transform_indices = @transform_0, window_bounds = array<i64: 1, 64, 64>}, {transform_indices = @transform_1, window_bounds = array<i64: 1, 64, 24>}, {pipeline_mode = #tpu.pipeline_mode<synchronous>, transform_indices = @transform_2, window_bounds = array<i64: 1, 24>}, {transform_indices = @transform_3, window_bounds = array<i64: 1, 64, 24>}]} {
    %c0 = arith.constant 0 : index
    %c0_0 = arith.constant 0 : index
    %c0_1 = arith.constant 0 : index
    %0 = vector.load %arg2[%c0, %c0_0, %c0_1] : memref<1x64x64xbf16, #tpu.memory_space<vmem>>, vector<1x64x64xbf16>
    %1 = vector.shape_cast %0 : vector<1x64x64xbf16> to vector<64x64xbf16>
    %c0_2 = arith.constant 0 : index
    %c0_3 = arith.constant 0 : index
    %c0_4 = arith.constant 0 : index
    %2 = vector.load %arg3[%c0_2, %c0_3, %c0_4] : memref<1x64x24xbf16, #tpu.memory_space<vmem>>, vector<1x64x24xbf16>
    %3 = vector.shape_cast %2 : vector<1x64x24xbf16> to vector<64x24xbf16>
    %cst = arith.constant dense<0.000000e+00> : vector<64x24xf32>
    %4 = tpu.matmul %1, %3, %cst {dimension_numbers = #tpu.dot_dimension_numbers<[1], [0], [0], [1], [0, 0, 1, 1], [], []>} : vector<64x64xbf16>, vector<64x24xbf16>, vector<64x24xf32> -> vector<64x24xf32>
    %c0_5 = arith.constant 0 : index
    %c0_6 = arith.constant 0 : index
    %5 = vector.load %arg4[%c0_5, %c0_6] : memref<1x24xf32, #tpu.memory_space<vmem>>, vector<1x24xf32>
    %6 = vector.broadcast %5 : vector<1x24xf32> to vector<64x24xf32>
    %7 = arith.addf %4, %6 : vector<64x24xf32>
    %8 = arith.truncf %7 : vector<64x24xf32> to vector<64x24xbf16>
    %c0_7 = arith.constant 0 : index
    %c0_8 = arith.constant 0 : index
    %c0_9 = arith.constant 0 : index
    %9 = vector.load %arg5[%c0_7, %c0_8, %c0_9] : memref<1x64x24xbf16, #tpu.memory_space<vmem>>, vector<1x64x24xbf16>
    %10 = vector.shape_cast %9 : vector<1x64x24xbf16> to vector<64x24xbf16>
    %11 = vector.shape_cast %8 : vector<64x24xbf16> to vector<1x64x24xbf16>
    tpu.vector_store %arg5[%c0_7, %c0_8, %c0_9], %11 {strides = array<i32>} : memref<1x64x24xbf16, #tpu.memory_space<vmem>>, vector<1x64x24xbf16>,
    return
  }
  func.func @transform_0(%arg0: i32, %arg1: i32) -> (i32, i32, i32) {
    %c0_i32 = arith.constant 0 : i32
    %c0_i32_0 = arith.constant 0 : i32
    return %arg0, %arg1, %c0_i32 : i32, i32, i32
  }
  func.func @transform_1(%arg0: i32, %arg1: i32) -> (i32, i32, i32) {
    %c0_i32 = arith.constant 0 : i32
    %c0_i32_0 = arith.constant 0 : i32
    %c0_i32_1 = arith.constant 0 : i32
    return %arg0, %c0_i32, %c0_i32_0 : i32, i32, i32
  }
  func.func @transform_2(%arg0: i32, %arg1: i32) -> (i32, i32) {
    %c0_i32 = arith.constant 0 : i32
    %c0_i32_0 = arith.constant 0 : i32
    %c0_i32_1 = arith.constant 0 : i32
    return %c0_i32, %c0_i32_0 : i32, i32
  }
  func.func @transform_3(%arg0: i32, %arg1: i32) -> (i32, i32, i32) {
    %c0_i32 = arith.constant 0 : i32
    %c0_i32_0 = arith.constant 0 : i32
    return %arg0, %arg1, %c0_i32 : i32, i32, i32
  }
}

module attributes {stable_mosaic.version = 11 : i64} {
  func.func @_head_gap_kernel(%arg0: i32, %arg1: i32, %arg2: memref<1x64x24xbf16, #tpu.memory_space<vmem>>, %arg3: memref<24x64xbf16, #tpu.memory_space<vmem>>, %arg4: memref<1x64xf32, #tpu.memory_space<vmem>>, %arg5: memref<1x1x64xf32, #tpu.memory_space<vmem>>) attributes {dimension_semantics = [#tpu.dimension_semantics<parallel>, #tpu.dimension_semantics<arbitrary>], iteration_bounds = array<i64: 2, 1>, scalar_prefetch = 0 : i64, scratch_operands = 0 : i64, tpu.core_type = #tpu.core_type<tc>, window_params = [{transform_indices = @transform_0, window_bounds = array<i64: 1, 64, 24>}, {pipeline_mode = #tpu.pipeline_mode<synchronous>, transform_indices = @transform_1, window_bounds = array<i64: 24, 64>}, {pipeline_mode = #tpu.pipeline_mode<synchronous>, transform_indices = @transform_2, window_bounds = array<i64: 1, 64>}, {transform_indices = @transform_3, window_bounds = array<i64: 1, 1, 64>}]} {
    %c0 = arith.constant 0 : index
    %c0_0 = arith.constant 0 : index
    %c0_1 = arith.constant 0 : index
    %0 = vector.load %arg2[%c0, %c0_0, %c0_1] : memref<1x64x24xbf16, #tpu.memory_space<vmem>>, vector<1x64x24xbf16>
    %1 = vector.shape_cast %0 : vector<1x64x24xbf16> to vector<64x24xbf16>
    %c0_2 = arith.constant 0 : index
    %c0_3 = arith.constant 0 : index
    %2 = vector.load %arg3[%c0_2, %c0_3] : memref<24x64xbf16, #tpu.memory_space<vmem>>, vector<24x64xbf16>
    %cst = arith.constant dense<0.000000e+00> : vector<64x64xf32>
    %3 = tpu.matmul %1, %2, %cst {dimension_numbers = #tpu.dot_dimension_numbers<[1], [0], [0], [1], [0, 0, 1, 1], [], []>} : vector<64x24xbf16>, vector<24x64xbf16>, vector<64x64xf32> -> vector<64x64xf32>
    %c0_4 = arith.constant 0 : index
    %c0_5 = arith.constant 0 : index
    %4 = vector.load %arg4[%c0_4, %c0_5] : memref<1x64xf32, #tpu.memory_space<vmem>>, vector<1x64xf32>
    %5 = vector.broadcast %4 : vector<1x64xf32> to vector<64x64xf32>
    %6 = arith.addf %3, %5 : vector<64x64xf32>
    %7 = arith.negf %6 : vector<64x64xf32>
    %8 = math.exp %7 : vector<64x64xf32>
    %cst_6 = arith.constant 1.000000e+00 : f32
    %9 = vector.broadcast %cst_6 : f32 to vector<64x64xf32>
    %10 = arith.addf %9, %8 : vector<64x64xf32>
    %11 = arith.divf %9, %10 : vector<64x64xf32>
    %12 = arith.mulf %6, %11 : vector<64x64xf32>
    %c0_i32 = arith.constant 0 : i32
    %13 = arith.cmpi eq, %arg1, %c0_i32 : i32
    %14 = arith.extui %13 : i1 to i32
    %c0_i32_7 = arith.constant 0 : i32
    %15 = arith.cmpi ne, %14, %c0_i32_7 : i32
    scf.if %15 {
      %cst_16 = arith.constant 0.000000e+00 : f32
      %25 = vector.broadcast %cst_16 : f32 to vector<1x1x64xf32>
      %c0_17 = arith.constant 0 : index
      %c0_18 = arith.constant 0 : index
      %c0_19 = arith.constant 0 : index
      %26 = vector.load %arg5[%c0_17, %c0_18, %c0_19] : memref<1x1x64xf32, #tpu.memory_space<vmem>>, vector<1x1x64xf32>
      tpu.vector_store %arg5[%c0_17, %c0_18, %c0_19], %25 {strides = array<i32>} : memref<1x1x64xf32, #tpu.memory_space<vmem>>, vector<1x1x64xf32>,
    } else {
    }
    %c0_8 = arith.constant 0 : index
    %c0_9 = arith.constant 0 : index
    %c0_10 = arith.constant 0 : index
    %16 = vector.load %arg5[%c0_8, %c0_9, %c0_10] : memref<1x1x64xf32, #tpu.memory_space<vmem>>, vector<1x1x64xf32>
    %17 = vector.shape_cast %16 : vector<1x1x64xf32> to vector<64xf32>
    %cst_11 = arith.constant dense<0.000000e+00> : vector<64xf32>
    %18 = vector.multi_reduction <add>, %12, %cst_11 [0] : vector<64x64xf32> to vector<64xf32>
    %cst_12 = arith.constant 1.562500e-02 : f32
    %19 = vector.broadcast %cst_12 : f32 to vector<64xf32>
    %20 = arith.mulf %18, %19 : vector<64xf32>
    %21 = arith.addf %17, %20 : vector<64xf32>
    %c0_13 = arith.constant 0 : index
    %c0_14 = arith.constant 0 : index
    %c0_15 = arith.constant 0 : index
    %22 = vector.load %arg5[%c0_13, %c0_14, %c0_15] : memref<1x1x64xf32, #tpu.memory_space<vmem>>, vector<1x1x64xf32>
    %23 = vector.shape_cast %22 : vector<1x1x64xf32> to vector<64xf32>
    %24 = vector.shape_cast %21 : vector<64xf32> to vector<1x1x64xf32>
    tpu.vector_store %arg5[%c0_13, %c0_14, %c0_15], %24 {strides = array<i32>} : memref<1x1x64xf32, #tpu.memory_space<vmem>>, vector<1x1x64xf32>,
    return
  }
  func.func @transform_0(%arg0: i32, %arg1: i32) -> (i32, i32, i32) {
    %c0_i32 = arith.constant 0 : i32
    %c0_i32_0 = arith.constant 0 : i32
    return %arg0, %arg1, %c0_i32 : i32, i32, i32
  }
  func.func @transform_1(%arg0: i32, %arg1: i32) -> (i32, i32) {
    %c0_i32 = arith.constant 0 : i32
    %c0_i32_0 = arith.constant 0 : i32
    %c0_i32_1 = arith.constant 0 : i32
    return %c0_i32, %c0_i32_0 : i32, i32
  }
  func.func @transform_2(%arg0: i32, %arg1: i32) -> (i32, i32) {
    %c0_i32 = arith.constant 0 : i32
    %c0_i32_0 = arith.constant 0 : i32
    %c0_i32_1 = arith.constant 0 : i32
    return %c0_i32, %c0_i32_0 : i32, i32
  }
  func.func @transform_3(%arg0: i32, %arg1: i32) -> (i32, i32, i32) {
    %c0_i32 = arith.constant 0 : i32
    %c0_i32_0 = arith.constant 0 : i32
    %c0_i32_1 = arith.constant 0 : i32
    return %arg0, %c0_i32, %c0_i32_0 : i32, i32, i32
  }
}

</mosaic_0001>

<bundles_post_ra>
// kernel: _lambda_.6
= control target key start
LH: loop header
LB: loop body
LE: loop exit
PB: predicated region body
PF: predicated region fallthrough
CT: control target
= control target key end

     0   :  { %s708_s12 = smov 0   ;;  %s710_s13 = smov 0   ;;  %s765_s0 = inlined_call_operand.vmem [shape: bf16[2,64,27], index: 0, kind: input, shape index: {}]   ;;  %s766_s1 = inlined_call_operand.vmem [shape: bf16[27,16], index: 1, kind: input, shape index: {}]   ;;  %s767_s2 = inlined_call_operand.vmem [shape: f32[1,16], index: 2, kind: input, shape index: {}]   ;;  %s768_s3 = inlined_call_operand.vmem [shape: bf16[2,64,16], index: 3, kind: output, shape index: {}]  }
   0x1   :  { %s712_s14 = smov 0  }
   0x2 LB: > { %s25_s15 = sadd.s32 1, %s681_s13  ;;  %p534_p0 = scmp.ge.s32.totalorder %s685_s14, 1  ;;  %s685_s14 = sphi %s712_s14, %s13_s14   ;;  %s681_s13 = sphi %s710_s13, %s770_s13   ;;  %s677_s12 = sphi %s708_s12, %s769_s12  }
   0x3   : > { %p27_p1 = scmp.ge.s32.totalorder %s25_s15, 2  ;;  %p158_p2 = scmp.lt.s32.totalorder %s685_s14, 3 }
   0x5   : > { %s772_s15 = smov (%p27_p1, %s25_s15), 0  ;;  %p159_p3 = pnand %p534_p0, %p158_p2 }
   0x6   : > { %p191_p4 = scmp.lt.s32.totalorder (!%p159_p3), %s677_s12, 1 }
   0x7   : > { %162 = sbr.rel (%p159_p3) target bundleno = 264 (0x108), region = 32 }
   0xc   : > { %v625_v0 = vld [vmem:[%s766_s1 + $0x8] sm:$0x3f]   ;;  %vm274_vm0 = vcmask 1044480   ;;  %vm275_vm1 = vcmask 1045504   ;;  %v687_v1 = vmov 65535   ;;  %v626_v5 = vld [vmem:[%s766_s1] sm:$0xff]  }
   0xd   : > { %v276_v2 = vsel %vm274_vm0, 4294967295, %v687_v1  ;;  %s774_s12 = smov (!%p191_p4, %s677_s12), 1  ;;  %vm261_vm2 = vcmask 220160   ;;  %v539_v10 = vld [vmem:[%s767_s2] ss:$0 sm:$0xff]  ;;  %vm434_vm3 = vcmask 125952  }
   0xe   : > { %v277_v3 = vsel %vm275_vm1, %v276_v2, 0  ;;  %s568_s20 = sshll.u32 %s774_s12, 5 }
   0xf   : > { %v279_v4 = vand.u32 %v625_v0, %v277_v3  ;;  %s198_s23 = scalar_lea.vmem %s765_s0, %s568_s20  ;;  %s208_s28 = scalar_lea.vmem %s768_s3, %s568_s20 }
  0x10   : > { %v627_v6 = vld [vmem:[%s198_s23] sm:$0xff]   ;;  %v628_v7 = vld [vmem:[%s198_s23 + $0x10] sm:$0xff]   ;;  %v629_v8 = vld [vmem:[%s198_s23 + $0x8] sm:$0xff]  }
  0x11   : > { %584 = vmatprep.subr.bf16.mxu0 %v279_v4  ;;  %596 = vmatprep.subr.bf16.mxu1 %v279_v4  ;;  %v630_v9 = vld [vmem:[%s198_s23 + $0x18] sm:$0xff]  }
  0x12   : > { %585 = vmatpush3.bf16.msra.mxu0 %v279_v4  ;;  %598 = vmatpush3.bf16.msra.mxu1 %v279_v4 }
  0x13   : > { %586 = vmatprep.subr.bf16.mxu0 %v626_v5  ;;  %597 = vmatprep.subr.bf16.mxu1 %v626_v5 }
  0x14   : > { %588 = vmatprep.mubr.msk.bf16.mxu0 %vm261_vm2, %v627_v6  ;;  %592 = vmatprep.mubr.msk.bf16.mxu1 %vm261_vm2, %v628_v7 }
  0x16   : > { %587 = vmatpush3.bf16.msra.mxu0 %v626_v5  ;;  %599 = vmatpush3.bf16.msra.mxu1 %v626_v5 }
  0x19   : > { %589 = vmatmul.mubr.msk.bf16.vlgmr.msra.gmra.mxu0 %vm261_vm2, %v629_v8  ;;  %593 = vmatmul.mubr.msk.bf16.vlgmr.msra.gmra.mxu1 %vm261_vm2, %v630_v9 }
  0xd9   : > { %v590_v11 = vpop.f32.mrf.mxu0  ;;  %v594_v12 = vpop.f32.mrf.mxu1 }
  0xda   : > { %v324_v13 = vadd.f32 %v590_v11, %v539_v10  ;;  %v340_v14 = vadd.f32 %v594_v12, %v539_v10 }
  0xdb   : > { %v315_v15 = vpop.f32.mrf.mxu0  ;;  %v331_v16 = vpop.f32.mrf.mxu1 }
  0xdc   : > { %v552_v17 = vmul.f32 -1.442695, %v324_v13  ;;  %v556_v18 = vmul.f32 -1.442695, %v340_v14  ;;  %v316_v19 = vadd.f32 %v539_v10, %v315_v15  ;;  %v332_v20 = vadd.f32 %v539_v10, %v331_v16 }
  0xdd   : > { %v591_v21 = vpop.f32.mrf.mxu0  ;;  %v595_v22 = vpop.f32.mrf.mxu1 }
  0xde   : > { %631 = vpow2.f32 %v552_v17  ;;  %v550_v23 = vmul.f32 -1.442695, %v316_v19  ;;  %v554_v24 = vmul.f32 -1.442695, %v332_v20  ;;  %v327_v25 = vadd.f32 %v591_v21, %v539_v10 }
  0xdf   : > { %633 = vpow2.f32 %v556_v18  ;;  %v343_v26 = vadd.f32 %v595_v22, %v539_v10  ;;  %v318_v27 = vpop.f32.mrf.mxu0  ;;  %v334_v28 = vpop.f32.mrf.mxu1 }
  0xe0   : > { %635 = vpow2.f32 %v550_v23  ;;  %v553_v29 = vmul.f32 -1.442695, %v327_v25  ;;  %v319_v30 = vadd.f32 %v539_v10, %v318_v27  ;;  %v335_v31 = vadd.f32 %v539_v10, %v334_v28 }
  0xe1   : > { %637 = vpow2.f32 %v554_v24  ;;  %v557_v32 = vmul.f32 -1.442695, %v343_v26 }
  0xe2   : > { %639 = vpow2.f32 %v553_v29  ;;  %v551_v33 = vmul.f32 -1.442695, %v319_v30  ;;  %v555_v34 = vmul.f32 -1.442695, %v335_v31 }
  0xe3   : > { %641 = vpow2.f32 %v557_v32 }
  0xe4   : > { %643 = vpow2.f32 %v551_v33 }
  0xe5   : > { %645 = vpow2.f32 %v555_v34 }
  0xeb   : > { %v632_v35 = vpop.eup %631 }
  0xec   : > { %v634_v36 = vpop.eup %633  ;;  %v372_v37 = vadd.f32 1.0, %v632_v35 }
  0xed   : > { %v636_v38 = vpop.eup %635  ;;  %v376_v39 = vadd.f32 1.0, %v634_v36 }
  0xee   : > { %v638_v40 = vpop.eup %637  ;;  %647 = vrcp.f32 %v372_v37  ;;  %v370_v41 = vadd.f32 1.0, %v636_v38 }
  0xef   : > { %v640_v42 = vpop.eup %639  ;;  %649 = vrcp.f32 %v376_v39  ;;  %v374_v43 = vadd.f32 1.0, %v638_v40 }
  0xf0   : > { %v642_v44 = vpop.eup %641  ;;  %651 = vrcp.f32 %v370_v41  ;;  %v373_v45 = vadd.f32 1.0, %v640_v42 }
  0xf1   : > { %v644_v46 = vpop.eup %643  ;;  %653 = vrcp.f32 %v374_v43  ;;  %v377_v47 = vadd.f32 1.0, %v642_v44 }
  0xf2   : > { %v646_v48 = vpop.eup %645  ;;  %655 = vrcp.f32 %v373_v45  ;;  %v371_v49 = vadd.f32 1.0, %v644_v46 }
  0xf3   : > { %657 = vrcp.f32 %v377_v47  ;;  %v375_v50 = vadd.f32 1.0, %v646_v48 }
  0xf4   : > { %659 = vrcp.f32 %v371_v49 }
  0xf5   : > { %661 = vrcp.f32 %v375_v50 }
  0xfb   : > { %v648_v51 = vpop.eup %647 }
  0xfc   : > { %v650_v52 = vpop.eup %649  ;;  %v396_v53 = vmul.f32 %v648_v51, %v324_v13 }
  0xfd   : > { %v652_v54 = vpop.eup %651  ;;  %v400_v55 = vmul.f32 %v650_v52, %v340_v14 }
  0xfe   : > { %v654_v56 = vpop.eup %653  ;;  %v572_v57 = vpack.c.bf16 %v396_v53, %v396_v53  ;;  %v394_v58 = vmul.f32 %v652_v54, %v316_v19 }
  0xff   : > { %v656_v59 = vpop.eup %655  ;;  %v576_v60 = vpack.c.bf16 %v400_v55, %v400_v55  ;;  %v398_v61 = vmul.f32 %v654_v56, %v332_v20 }
 0x100   : > { %v658_v62 = vpop.eup %657  ;;  %437 = vst.msk [vmem:[%s208_s28 + $0x8] sm:$0xf] %vm434_vm3, %v572_v57  ;;  %v570_v63 = vpack.c.bf16 %v394_v58, %v394_v58  ;;  %v397_v0 = vmul.f32 %v656_v59, %v327_v25 }
 0x101   : > { %v660_v1 = vpop.eup %659  ;;  %441 = vst.msk [vmem:[%s208_s28 + $0x18] sm:$0xf] %vm434_vm3, %v576_v60  ;;  %v574_v2 = vpack.c.bf16 %v398_v61, %v398_v61  ;;  %v401_v3 = vmul.f32 %v658_v62, %v343_v26 }
 0x102   : > { %v662_v4 = vpop.eup %661  ;;  %435 = vst.msk [vmem:[%s208_s28] sm:$0xf] %vm434_vm3, %v570_v63  ;;  %v573_v5 = vpack.c.bf16 %v397_v0, %v397_v0  ;;  %v395_v6 = vmul.f32 %v660_v1, %v319_v30 }
 0x103   : > { %439 = vst.msk [vmem:[%s208_s28 + $0x10] sm:$0xf] %vm434_vm3, %v574_v2  ;;  %v577_v7 = vpack.c.bf16 %v401_v3, %v401_v3  ;;  %v399_v8 = vmul.f32 %v662_v4, %v335_v31 }
 0x104   : > { %438 = vst.msk [vmem:[%s208_s28 + $0xc] sm:$0xf] %vm434_vm3, %v573_v5  ;;  %v571_v9 = vpack.c.bf16 %v395_v6, %v395_v6 }
 0x105   : > { %442 = vst.msk [vmem:[%s208_s28 + $0x1c] sm:$0xf] %vm434_vm3, %v577_v7  ;;  %v575_v10 = vpack.c.bf16 %v399_v8, %v399_v8 }
 0x106   : > { %436 = vst.msk [vmem:[%s208_s28 + $0x4] sm:$0xf] %vm434_vm3, %v571_v9 }
 0x107   : > { %440 = vst.msk [vmem:[%s208_s28 + $0x14] sm:$0xf] %vm434_vm3, %v575_v10 }
 0x108 PF: > { %s13_s14 = sadd.s32 1, %s685_s14   ;;  %s769_s12 = smov %s681_s13 }
 0x109   : > { %p10_p5 = scmp.ge.s32.totalorder %s13_s14, 4   ;;  %s770_s13 = smov %s772_s15 }
 0x10b   :  { %12 = sbr.rel (!%p10_p5) target bundleno = 2 (0x2), region = 62 }

// kernel: _lambda_.10
= control target key start
LH: loop header
LB: loop body
LE: loop exit
PB: predicated region body
PF: predicated region fallthrough
CT: control target
= control target key end

     0   :  { %s669_s12 = smov 0   ;;  %s671_s13 = smov 0   ;;  %s725_s0 = inlined_call_operand.vmem [shape: bf16[2,64,64], index: 0, kind: input, shape index: {}]   ;;  %s726_s1 = inlined_call_operand.vmem [shape: bf16[2,64,24], index: 1, kind: input, shape index: {}]   ;;  %s727_s2 = inlined_call_operand.vmem [shape: f32[1,24], index: 2, kind: input, shape index: {}]   ;;  %s728_s3 = inlined_call_operand.vmem [shape: bf16[2,64,24], index: 3, kind: output, shape index: {}]  }
   0x1   :  { %s673_s14 = smov 0  }
   0x2 LB: > { %s25_s15 = sadd.s32 1, %s643_s13  ;;  %p520_p0 = scmp.ge.s32.totalorder %s647_s14, 1  ;;  %s647_s14 = sphi %s673_s14, %s13_s14   ;;  %s643_s13 = sphi %s671_s13, %s730_s13   ;;  %s639_s12 = sphi %s669_s12, %s729_s12  }
   0x3   : > { %p27_p1 = scmp.ge.s32.totalorder %s25_s15, 2  ;;  %p168_p2 = scmp.lt.s32.totalorder %s647_s14, 3 }
   0x5   : > { %s732_s15 = smov (%p27_p1, %s25_s15), 0  ;;  %p169_p3 = pnand %p520_p0, %p168_p2 }
   0x6   : > { %p206_p4 = scmp.lt.s32.totalorder (!%p169_p3), %s639_s12, 1 }
   0x7   : > { %172 = sbr.rel (%p169_p3) target bundleno = 236 (0xec), region = 32 }
   0xc   : > { %s734_s12 = smov (!%p206_p4, %s639_s12), 1  ;;  %vm298_vm0 = vcmask 523264   ;;  %v527_v8 = vld [vmem:[%s727_s2] ss:$0 sm:$0xff]  ;;  %vm408_vm1 = vcmask 191488  }
   0xd   : > { %s687_s16 = sshll.u32 %s734_s12, 5 }
   0xe   : > { %s219_s19 = scalar_lea.vmem %s726_s1, %s687_s16  ;;  %s213_s22 = scalar_lea.vmem %s725_s0, %s687_s16 }
   0xf   : > { %v617_v0 = vld [vmem:[%s219_s19 + $0x18] sm:$0xff]   ;;  %v618_v1 = vld [vmem:[%s219_s19 + $0x10] sm:$0xff]   ;;  %v619_v2 = vld [vmem:[%s219_s19 + $0x8] sm:$0xff]   ;;  %s228_s27 = scalar_lea.vmem %s728_s3, %s687_s16 }
  0x10   : > { %569 = vmatprep.subr.bf16.mxu0 %v617_v0  ;;  %585 = vmatprep.subr.bf16.mxu1 %v617_v0  ;;  %v621_v3 = vld [vmem:[%s213_s22] sm:$0xff]   ;;  %v622_v4 = vld [vmem:[%s213_s22 + $0x10] sm:$0xff]   ;;  %v623_v6 = vld [vmem:[%s213_s22 + $0x8] sm:$0xff]  }
  0x11   : > { %570 = vmatpush3.bf16.msra.mxu0 %v617_v0  ;;  %589 = vmatpush3.bf16.msra.mxu1 %v617_v0  ;;  %v620_v5 = vld [vmem:[%s219_s19] sm:$0xff]   ;;  %v624_v7 = vld [vmem:[%s213_s22 + $0x18] sm:$0xff]  }
  0x12   : > { %571 = vmatprep.subr.bf16.mxu0 %v618_v1  ;;  %586 = vmatprep.subr.bf16.mxu1 %v618_v1 }
  0x13   : > { %577 = vmatprep.mubr.msk.bf16.mxu0 %vm298_vm0, %v621_v3  ;;  %581 = vmatprep.mubr.msk.bf16.mxu1 %vm298_vm0, %v622_v4 }
  0x15   : > { %572 = vmatpush3.bf16.msra.mxu0 %v618_v1  ;;  %590 = vmatpush3.bf16.msra.mxu1 %v618_v1 }
  0x16   : > { %573 = vmatprep.subr.bf16.mxu0 %v619_v2  ;;  %587 = vmatprep.subr.bf16.mxu1 %v619_v2 }
  0x19   : > { %574 = vmatpush3.bf16.msra.mxu0 %v619_v2  ;;  %591 = vmatpush3.bf16.msra.mxu1 %v619_v2 }
  0x1a   : > { %575 = vmatprep.subr.bf16.mxu0 %v620_v5  ;;  %588 = vmatprep.subr.bf16.mxu1 %v620_v5 }
  0x1d   : > { %576 = vmatpush3.bf16.msra.mxu0 %v620_v5  ;;  %592 = vmatpush3.bf16.msra.mxu1 %v620_v5 }
  0x20   : > { %578 = vmatmul.mubr.msk.bf16.vlgmr.msra.gmra.mxu0 %vm298_vm0, %v623_v6  ;;  %582 = vmatmul.mubr.msk.bf16.vlgmr.msra.gmra.mxu1 %vm298_vm0, %v624_v7 }
  0xe0   : > { %v579_v9 = vpop.f32.mrf.mxu0  ;;  %v583_v10 = vpop.f32.mrf.mxu1 }
  0xe1   : > { %v354_v11 = vadd.f32 %v579_v9, %v527_v8  ;;  %v370_v12 = vadd.f32 %v583_v10, %v527_v8 }
  0xe2   : > { %v345_v13 = vpop.f32.mrf.mxu0  ;;  %v361_v14 = vpop.f32.mrf.mxu1 }
  0xe3   : > { %v555_v15 = vpack.c.bf16 %v354_v11, %v354_v11  ;;  %v559_v16 = vpack.c.bf16 %v370_v12, %v370_v12  ;;  %v346_v17 = vadd.f32 %v527_v8, %v345_v13  ;;  %v362_v18 = vadd.f32 %v527_v8, %v361_v14 }
  0xe4   : > { %v580_v19 = vpop.f32.mrf.mxu0  ;;  %v584_v20 = vpop.f32.mrf.mxu1 }
  0xe5   : > { %411 = vst.msk [vmem:[%s228_s27 + $0x8] sm:$0xf] %vm408_vm1, %v555_v15  ;;  %415 = vst.msk [vmem:[%s228_s27 + $0x18] sm:$0xf] %vm408_vm1, %v559_v16  ;;  %v553_v21 = vpack.c.bf16 %v346_v17, %v346_v17  ;;  %v557_v22 = vpack.c.bf16 %v362_v18, %v362_v18  ;;  %v357_v23 = vadd.f32 %v580_v19, %v527_v8 }
  0xe6   : > { %v373_v24 = vadd.f32 %v584_v20, %v527_v8  ;;  %v348_v25 = vpop.f32.mrf.mxu0  ;;  %v364_v26 = vpop.f32.mrf.mxu1 }
  0xe7   : > { %409 = vst.msk [vmem:[%s228_s27] sm:$0xf] %vm408_vm1, %v553_v21  ;;  %413 = vst.msk [vmem:[%s228_s27 + $0x10] sm:$0xf] %vm408_vm1, %v557_v22  ;;  %v556_v27 = vpack.c.bf16 %v357_v23, %v357_v23  ;;  %v349_v29 = vadd.f32 %v527_v8, %v348_v25  ;;  %v365_v30 = vadd.f32 %v527_v8, %v364_v26 }
  0xe8   : > { %v560_v28 = vpack.c.bf16 %v373_v24, %v373_v24 }
  0xe9   : > { %412 = vst.msk [vmem:[%s228_s27 + $0xc] sm:$0xf] %vm408_vm1, %v556_v27  ;;  %v554_v31 = vpack.c.bf16 %v349_v29, %v349_v29  ;;  %v558_v32 = vpack.c.bf16 %v365_v30, %v365_v30 }
  0xea   : > { %416 = vst.msk [vmem:[%s228_s27 + $0x1c] sm:$0xf] %vm408_vm1, %v560_v28 }
  0xeb   : > { %410 = vst.msk [vmem:[%s228_s27 + $0x4] sm:$0xf] %vm408_vm1, %v554_v31  ;;  %414 = vst.msk [vmem:[%s228_s27 + $0x14] sm:$0xf] %vm408_vm1, %v558_v32 }
  0xec PF: > { %s13_s14 = sadd.s32 1, %s647_s14   ;;  %s729_s12 = smov %s643_s13 }
  0xed   : > { %p10_p5 = scmp.ge.s32.totalorder %s13_s14, 4   ;;  %s730_s13 = smov %s732_s15 }
  0xef   :  { %12 = sbr.rel (!%p10_p5) target bundleno = 2 (0x2), region = 65 }

// kernel: _lambda_.8
= control target key start
LH: loop header
LB: loop body
LE: loop exit
PB: predicated region body
PF: predicated region fallthrough
CT: control target
= control target key end

     0   :  { %s801_s15 = smov 0   ;;  %s803_s16 = smov 0   ;;  %s871_s0 = inlined_call_operand.vmem [shape: bf16[2,64,64], index: 0, kind: input, shape index: {}]   ;;  %s872_s1 = inlined_call_operand.vmem [shape: bf16[2,64,16], index: 1, kind: input, shape index: {}]   ;;  %s873_s2 = inlined_call_operand.vmem [shape: f32[1,16], index: 2, kind: input, shape index: {}]   ;;  %s874_s3 = inlined_call_operand.vmem [shape: bf16[2,64,16], index: 3, kind: input, shape index: {}]   ;;  %s875_s4 = inlined_call_operand.vmem [shape: bf16[2,64,16], index: 4, kind: output, shape index: {}]  }
   0x1   :  { %s805_s17 = smov 0  }
   0x2 LB: > { %s26_s18 = sadd.s32 1, %s770_s16  ;;  %p625_p0 = scmp.ge.s32.totalorder %s774_s17, 1  ;;  %s774_s17 = sphi %s805_s17, %s14_s17   ;;  %s770_s16 = sphi %s803_s16, %s877_s16   ;;  %s766_s15 = sphi %s801_s15, %s876_s15  }
   0x3   : > { %p28_p1 = scmp.ge.s32.totalorder %s26_s18, 2  ;;  %p210_p2 = scmp.lt.s32.totalorder %s774_s17, 3 }
   0x5   : > { %s879_s18 = smov (%p28_p1, %s26_s18), 0  ;;  %p211_p3 = pnand %p625_p0, %p210_p2 }
   0x6   : > { %p259_p4 = scmp.lt.s32.totalorder (!%p211_p3), %s766_s15, 1 }
   0x7   : > { %214 = sbr.rel (%p211_p3) target bundleno = 239 (0xef), region = 36 }
   0xc   : > { %s881_s15 = smov (!%p259_p4, %s766_s15), 1  ;;  %vm361_vm0 = vcmask 523264   ;;  %v634_v10 = vld [vmem:[%s873_s2] ss:$0 sm:$0xff]  ;;  %vm495_vm1 = vcmask 125952  }
   0xd   : > { %s819_s19 = sshll.u32 %s881_s15, 5 }
   0xe   : > { %s272_s22 = scalar_lea.vmem %s872_s1, %s819_s19  ;;  %s266_s25 = scalar_lea.vmem %s871_s0, %s819_s19 }
   0xf   : > { %v744_v0 = vld [vmem:[%s272_s22 + $0x18] sm:$0xff]   ;;  %v745_v1 = vld [vmem:[%s272_s22 + $0x10] sm:$0xff]   ;;  %v746_v2 = vld [vmem:[%s272_s22 + $0x8] sm:$0xff]   ;;  %s281_s28 = scalar_lea.vmem %s874_s3, %s819_s19  ;;  %s844_s7 = scalar_lea.vmem %s875_s4, %s819_s19 }
  0x10   : > { %696 = vmatprep.subr.bf16.mxu0 %v744_v0  ;;  %712 = vmatprep.subr.bf16.mxu1 %v744_v0  ;;  %v748_v3 = vld [vmem:[%s266_s25] sm:$0xff]   ;;  %v749_v4 = vld [vmem:[%s266_s25 + $0x10] sm:$0xff]   ;;  %v750_v6 = vld [vmem:[%s266_s25 + $0x8] sm:$0xff]  }
  0x11   : > { %697 = vmatpush3.bf16.msra.mxu0 %v744_v0  ;;  %716 = vmatpush3.bf16.msra.mxu1 %v744_v0  ;;  %v747_v5 = vld [vmem:[%s272_s22] sm:$0xff]   ;;  %v751_v7 = vld [vmem:[%s266_s25 + $0x18] sm:$0xff]   ;;  %v685_v8 = vld [vmem:[%s281_s28 + $0x8] sm:$0xff]  }
  0x12   : > { %698 = vmatprep.subr.bf16.mxu0 %v745_v1  ;;  %713 = vmatprep.subr.bf16.mxu1 %v745_v1  ;;  %v687_v9 = vld [vmem:[%s281_s28 + $0x18] sm:$0xff]   ;;  %v670_v11 = vld [vmem:[%s281_s28] sm:$0xff]   ;;  %v686_v12 = vld [vmem:[%s281_s28 + $0x10] sm:$0xff]   ;;  %v675_v13 = vunpack.c.l.bf16 %v685_v8  ;;  %v676_v28 = vunpack.c.h.bf16 %v685_v8 }
  0x13   : > { %704 = vmatprep.mubr.msk.bf16.mxu0 %vm361_vm0, %v748_v3  ;;  %708 = vmatprep.mubr.msk.bf16.mxu1 %vm361_vm0, %v749_v4  ;;  %v683_v14 = vunpack.c.l.bf16 %v687_v9  ;;  %v671_v19 = vunpack.c.l.bf16 %v670_v11  ;;  %v679_v20 = vunpack.c.l.bf16 %v686_v12  ;;  %v684_v30 = vunpack.c.h.bf16 %v687_v9 }
  0x14   : > { %v672_v31 = vunpack.c.h.bf16 %v670_v11  ;;  %v680_v32 = vunpack.c.h.bf16 %v686_v12 }
  0x15   : > { %699 = vmatpush3.bf16.msra.mxu0 %v745_v1  ;;  %717 = vmatpush3.bf16.msra.mxu1 %v745_v1 }
  0x16   : > { %700 = vmatprep.subr.bf16.mxu0 %v746_v2  ;;  %714 = vmatprep.subr.bf16.mxu1 %v746_v2 }
  0x19   : > { %701 = vmatpush3.bf16.msra.mxu0 %v746_v2  ;;  %718 = vmatpush3.bf16.msra.mxu1 %v746_v2 }
  0x1a   : > { %702 = vmatprep.subr.bf16.mxu0 %v747_v5  ;;  %715 = vmatprep.subr.bf16.mxu1 %v747_v5 }
  0x1d   : > { %703 = vmatpush3.bf16.msra.mxu0 %v747_v5  ;;  %719 = vmatpush3.bf16.msra.mxu1 %v747_v5 }
  0x20   : > { %705 = vmatmul.mubr.msk.bf16.vlgmr.msra.gmra.mxu0 %vm361_vm0, %v750_v6  ;;  %709 = vmatmul.mubr.msk.bf16.vlgmr.msra.gmra.mxu1 %vm361_vm0, %v751_v7 }
  0xe0   : > { %v706_v15 = vpop.f32.mrf.mxu0  ;;  %v710_v16 = vpop.f32.mrf.mxu1 }
  0xe1   : > { %v417_v17 = vadd.f32 %v706_v15, %v634_v10  ;;  %v433_v18 = vadd.f32 %v710_v16, %v634_v10 }
  0xe2   : > { %v408_v21 = vpop.f32.mrf.mxu0  ;;  %v424_v22 = vpop.f32.mrf.mxu1 }
  0xe3   : > { %v457_v23 = vadd.f32 %v675_v13, %v417_v17  ;;  %v461_v24 = vadd.f32 %v683_v14, %v433_v18  ;;  %v409_v25 = vadd.f32 %v634_v10, %v408_v21  ;;  %v425_v26 = vadd.f32 %v634_v10, %v424_v22 }
  0xe4   : > { %v707_v27 = vpop.f32.mrf.mxu0  ;;  %v711_v29 = vpop.f32.mrf.mxu1 }
  0xe5   : > { %v663_v33 = vpack.c.bf16 %v457_v23, %v457_v23  ;;  %v667_v34 = vpack.c.bf16 %v461_v24, %v461_v24  ;;  %v455_v35 = vadd.f32 %v671_v19, %v409_v25  ;;  %v459_v36 = vadd.f32 %v679_v20, %v425_v26 }
  0xe6   : > { %v420_v37 = vadd.f32 %v707_v27, %v634_v10  ;;  %v436_v38 = vadd.f32 %v711_v29, %v634_v10  ;;  %v411_v39 = vpop.f32.mrf.mxu0  ;;  %v427_v40 = vpop.f32.mrf.mxu1 }
  0xe7   : > { %498 = vst.msk [vmem:[%s844_s7 + $0x8] sm:$0xf] %vm495_vm1, %v663_v33  ;;  %502 = vst.msk [vmem:[%s844_s7 + $0x18] sm:$0xf] %vm495_vm1, %v667_v34  ;;  %v661_v41 = vpack.c.bf16 %v455_v35, %v455_v35  ;;  %v665_v42 = vpack.c.bf16 %v459_v36, %v459_v36  ;;  %v412_v43 = vadd.f32 %v634_v10, %v411_v39 }
  0xe8   : > { %v428_v44 = vadd.f32 %v634_v10, %v427_v40  ;;  %v458_v45 = vadd.f32 %v676_v28, %v420_v37  ;;  %v462_v46 = vadd.f32 %v684_v30, %v436_v38 }
  0xe9   : > { %496 = vst.msk [vmem:[%s844_s7] sm:$0xf] %vm495_vm1, %v661_v41  ;;  %500 = vst.msk [vmem:[%s844_s7 + $0x10] sm:$0xf] %vm495_vm1, %v665_v42  ;;  %v456_v47 = vadd.f32 %v672_v31, %v412_v43 }
  0xea   : > { %v460_v48 = vadd.f32 %v680_v32, %v428_v44  ;;  %v664_v49 = vpack.c.bf16 %v458_v45, %v458_v45  ;;  %v668_v50 = vpack.c.bf16 %v462_v46, %v462_v46 }
  0xeb   : > { %v662_v51 = vpack.c.bf16 %v456_v47, %v456_v47 }
  0xec   : > { %v666_v52 = vpack.c.bf16 %v460_v48, %v460_v48  ;;  %499 = vst.msk [vmem:[%s844_s7 + $0xc] sm:$0xf] %vm495_vm1, %v664_v49  ;;  %503 = vst.msk [vmem:[%s844_s7 + $0x1c] sm:$0xf] %vm495_vm1, %v668_v50 }
  0xed   : > { %497 = vst.msk [vmem:[%s844_s7 + $0x4] sm:$0xf] %vm495_vm1, %v662_v51 }
  0xee   : > { %501 = vst.msk [vmem:[%s844_s7 + $0x14] sm:$0xf] %vm495_vm1, %v666_v52 }
  0xef PF: > { %s14_s17 = sadd.s32 1, %s774_s17   ;;  %s876_s15 = smov %s770_s16 }
  0xf0   : > { %p11_p5 = scmp.ge.s32.totalorder %s14_s17, 4   ;;  %s877_s16 = smov %s879_s18 }
  0xf2   :  { %13 = sbr.rel (!%p11_p5) target bundleno = 2 (0x2), region = 72 }

// kernel: _lambda_.7
= control target key start
LH: loop header
LB: loop body
LE: loop exit
PB: predicated region body
PF: predicated region fallthrough
CT: control target
= control target key end

     0   :  { %s1828_s27 = smov 0   ;;  %s1830_s28 = smov 0   ;;  %s2418_s0 = inlined_call_operand.vmem [shape: bf16[2,64,16], index: 0, kind: input, shape index: {}, may-alias: {0,1,2}]   ;;  %s2419_s1 = inlined_call_operand.vmem [shape: bf16[2,64,16], index: 1, kind: input, shape index: {}, may-alias: {0,1,2}]   ;;  %s2420_s2 = inlined_call_operand.vmem [shape: bf16[2,64,16], index: 2, kind: input, shape index: {}, may-alias: {0,1,2}]   ;;  %s2421_s3 = inlined_call_operand.vmem [shape: bf16[16,64], index: 3, kind: input, shape index: {}]   ;;  %s2422_s4 = inlined_call_operand.vmem [shape: f32[1,64], index: 4, kind: input, shape index: {}]   ;;  %s2423_s5 = inlined_call_operand.vmem [shape: f32[9,64], index: 5, kind: input, shape index: {}]   ;;  %s2424_s6 = inlined_call_operand.vmem [shape: f32[1,64], index: 6, kind: input, shape index: {}]   ;;  %s2425_s7 = inlined_call_operand.vmem [shape: bf16[2,64,64], index: 7, kind: output, shape index: {0}]   ;;  %s2426_s8 = inlined_call_operand.vmem [shape: f32[2,1,64], index: 8, kind: output, shape index: {1}]  }
   0x1   :  { %s1832_s29 = smov 0  }
   0x2 LB: > { %s31_s30 = sadd.s32 1, %s1775_s28  ;;  %p1558_p0 = scmp.ge.s32.totalorder %s1779_s29, 1  ;;  %s1779_s29 = sphi %s1832_s29, %s19_s29   ;;  %s1775_s28 = sphi %s1830_s28, %s2486_s28   ;;  %s1771_s27 = sphi %s1828_s27, %s2485_s27  }
   0x3   : > { %p33_p1 = scmp.ge.s32.totalorder %s31_s30, 2  ;;  %p348_p2 = scmp.lt.s32.totalorder %s1779_s29, 3 }
   0x5   : > { %s2488_s30 = smov (%p33_p1, %s31_s30), 0  ;;  %p349_p3 = pnand %p1558_p0, %p348_p2 }
   0x7   : > { %352 = sbr.rel (%p349_p3) target bundleno = 375 (0x177), region = 48 }
   0xc   : > { %v1688_v0 = vld [vmem:[%s2421_s3] sm:$0xff]   ;;  %p421_p4 = scmp.lt.s32.totalorder %s1771_s27, 1  ;;  %v1781_v1 = vmov 0.0   ;;  %vm1370_vm0 = vcmask 516096   ;;  %vm1782_vm1 = vmmov 0   ;;  %vm482_vm2 = vcmask 130048  }
   0xd   : > { %1646 = vmatprep.subr.bf16.mxu1 %v1688_v0  ;;  %1640 = vmatprep.subr.bf16.mxu0 %v1781_v1  ;;  %v1578_v8 = vld [vmem:[%s2422_s4] ss:$0 sm:$0xff]  ;;  %v762_v33 = vlaneseq  ;;  %v1911_v48 = vrot.slane %v1781_v1, 7  ;;  %vm981_vm3 = vcmask 1040384   ;;  %v1937_v63 = vld [vmem:[%s2423_s5 + $0x1] ss:$0 sm:$0xff] }
   0xe   : > { %s2490_s27 = smov (!%p421_p4, %s1771_s27), 1  ;;  %1647 = vmatpush3.bf16.msra.mxu1 %v1688_v0  ;;  %1641 = vmatpush3.bf16.msra.mxu0 %v1688_v0  ;;  %v1932_v61 = vld [vmem:[%s2423_s5] ss:$0 sm:$0xff]  ;;  %vm1032_vm5 = vcmask 1046528  }
   0xf   : > { %s1850_s11 = sshll.u32 %s2490_s27, 5  ;;  %s1855_s14 = scalar_lea.vmem %s2426_s8, %s2490_s27  ;;  %1642 = vmatprep.mubr.msk.bf16.mxu0 %vm1782_vm1, %v1781_v1  ;;  %1656 = vmatprep.subr.bf16.mxu0 %v1781_v1  ;;  %v763_v41 = vshrl.u32 %v762_v33, 7  ;;  %v1011_v54 = vsel %vm981_vm3, 0.0, %v1911_v48 }
  0x10   : > { %s441_s17 = scalar_lea.vmem %s2419_s1, %s1850_s11  ;;  %1371 = vst.msk [vmem:[%s1855_s14] sm:$0x1] %vm1370_vm0, %v1781_v1  ;;  %s428_s20 = scalar_lea.vmem %s2418_s0, %s1850_s11 }
  0x11   : > { %v1689_v2 = vld [vmem:[%s441_s17] sm:$0xff]   ;;  %v1690_v3 = vld [vmem:[%s441_s17 + $0x8] sm:$0xff]   ;;  %v1691_v4 = vld [vmem:[%s441_s17 + $0x10] sm:$0xff]   ;;  %s1620_s21 = sadd.s32 28, %s1850_s11  ;;  %v845_v47 = vand.u32 7, %v763_v41  ;;  %v1913_v52 = vadd.s32 8, %v763_v41  ;;  %s2378_s15 = scalar_lea.vmem %s2425_s7, %s1850_s11 }
  0x12   : > { %1648 = vmatprep.mubr.msk.bf16.mxu1 %vm482_vm2, %v1689_v2  ;;  %v475_v5 = vld [vmem:[%s428_s20] sm:$0xf]  ;;  %v1692_v6 = vld [vmem:[%s441_s17 + $0x18] sm:$0xff]   ;;  %s454_s24 = scalar_lea.vmem %s2420_s2, %s1620_s21  ;;  %v1921_v57 = vadd.s32 24, %v763_v41  ;;  %v1923_v58 = vadd.s32 72, %v763_v41  ;;  %v1925_v59 = vadd.s32 32, %v763_v41 }
  0x13   : > { %1649 = vmatmul.mubr.msk.bf16.vlgmr.msra.gmra.mxu1 %vm482_vm2, %v1690_v3  ;;  %1643 = vmatmul.mubr.msk.bf16.vlgmr.msra.gmra.mxu0 %vm482_vm2, %v475_v5  ;;  %v631_v7 = vld [vmem:[%s454_s24] sm:$0xf]  ;;  %vm1915_vm4 = vcmp.eq.s32.totalorder %v845_v47, 0  ;;  %v1941_v2 = vrot.slane %v1781_v1, 1  ;;  %v1091_v5 = vmul.f32 0.0, %v1937_v63  ;;  %vm1968_vm8 = vcmp.eq.s32.totalorder %v845_v47, 7 }
  0x14   : > { %1652 = vmatprep.mubr.msk.bf16.mxu1 %vm482_vm2, %v1691_v4  ;;  %1657 = vmatpush3.bf16.msra.mxu0 %v1688_v0  ;;  %v1012_v60 = vsel %vm1915_vm4, 0.0, %v1011_v54  ;;  %v852_v0 = vand.u32 7, %v1913_v52 }
  0x15   : > { %1658 = vmatprep.mubr.msk.bf16.mxu0 %vm1782_vm1, %v1781_v1  ;;  %v1950_v1 = vadd.s32 56, %v763_v41 }
  0x16   : > { %vm1964_vm7 = vcmp.eq.s32.totalorder %v852_v0, 0  ;;  %vm2033_vm11 = vcmp.eq.s32.totalorder %v852_v0, 7  ;;  %v2055_v0 = vld [vmem:[%s2423_s5 + $0x2] ss:$0 sm:$0xff] }
  0x1b   : > { %1653 = vmatmul.mubr.msk.bf16.gmra.mxu1 %vm482_vm2, %v1692_v6  ;;  %1659 = vmatmul.mubr.msk.bf16.vlgmr.msra.gmra.mxu0 %vm482_vm2, %v631_v7  ;;  %v866_v6 = vand.u32 7, %v1921_v57  ;;  %v2429_v7 = vand.u32 7, %v1923_v58 }
  0x1d   : > { %vm1954_vm6 = vcmp.eq.s32.totalorder %v2429_v7, 7  ;;  %vm1972_vm9 = vcmp.eq.s32.totalorder %v866_v6, 7  ;;  %vm2044_vm13 = vcmp.eq.s32.totalorder %v866_v6, 0 }
  0xd3   : > { %v1650_v9 = vpop.f32.mrf.mxu1  ;;  %v520_v12 = vpop.f32.mrf.mxu0 }
  0xd4   : > { %v1886_v10 = vadd.f32 %v1650_v9, %v1578_v8  ;;  %v873_v9 = vand.u32 7, %v1925_v59  ;;  %v1948_v12 = vadd.s32 40, %v763_v41 }
  0xd5   : > { %v600_v11 = vpop.f32.mrf.mxu1  ;;  %v1644_v16 = vpop.f32.mrf.mxu0 }
  0xd6   : > { %v1582_v13 = vmul.f32 -1.442695, %v1886_v10  ;;  %v1889_v14 = vadd.f32 %v1578_v8, %v600_v11  ;;  %v765_v11 = vadd.s32 16, %v763_v41  ;;  %vm1986_vm10 = vcmp.eq.s32.totalorder %v873_v9, 0 }
  0xd7   : > { %v1651_v15 = vpop.f32.mrf.mxu1  ;;  %v523_v20 = vpop.f32.mrf.mxu0  ;;  %vm2148_vm1 = vcmp.eq.s32.totalorder %v873_v9, 7 }
  0xd8   : > { %1693 = vpow2.f32 %v1582_v13  ;;  %v1580_v17 = vmul.f32 -1.442695, %v1889_v14  ;;  %v1892_v18 = vadd.f32 %v1651_v15, %v1578_v8  ;;  %v1960_v20 = vadd.s32 64, %v763_v41 }
  0xd9   : > { %v603_v19 = vpop.f32.mrf.mxu1  ;;  %v1645_v24 = vpop.f32.mrf.mxu0 }
  0xda   : > { %1695 = vpow2.f32 %v1580_v17  ;;  %v1583_v21 = vmul.f32 -1.442695, %v1892_v18  ;;  %v1895_v22 = vadd.f32 %v1578_v8, %v603_v19  ;;  %v1062_v17 = vsel %vm1032_vm5, %v1941_v2, 0.0 }
  0xdb   : > { %v1654_v23 = vpop.f32.mrf.mxu1  ;;  %v669_v28 = vpop.f32.mrf.mxu0 }
  0xdc   : > { %1697 = vpow2.f32 %v1583_v21  ;;  %v1581_v25 = vmul.f32 -1.442695, %v1895_v22  ;;  %v1898_v26 = vadd.f32 %v1654_v23, %v1578_v8  ;;  %v1962_v21 = vadd.s32 48, %v763_v41  ;;  %v2002_v41 = vld [vmem:[%s2423_s5 + $0x8] ss:$0 sm:$0xff] }
  0xdd   : > { %v616_v27 = vpop.f32.mrf.mxu1  ;;  %v1660_v32 = vpop.f32.mrf.mxu0 }
  0xde   : > { %1699 = vpow2.f32 %v1581_v25  ;;  %v1586_v29 = vmul.f32 -1.442695, %v1898_v26  ;;  %v1901_v30 = vadd.f32 %v1578_v8, %v616_v27  ;;  %v2098_v25 = vld [vmem:[%s2423_s5 + $0x5] ss:$0 sm:$0xff] }
  0xdf   : > { %v1655_v31 = vpop.f32.mrf.mxu1  ;;  %v672_v37 = vpop.f32.mrf.mxu0 }
  0xe0   : > { %1701 = vpow2.f32 %v1586_v29  ;;  %v1584_v34 = vmul.f32 -1.442695, %v1901_v30  ;;  %v1904_v35 = vadd.f32 %v1655_v31, %v1578_v8  ;;  %v1982_v31 = vld [vmem:[%s2423_s5 + $0x4] ss:$0 sm:$0xff]  ;;  %v859_v37 = vand.u32 7, %v765_v11 }
  0xe1   : > { %v619_v36 = vpop.f32.mrf.mxu1  ;;  %v1661_v40 = vpop.f32.mrf.mxu0 }
  0xe2   : > { %v1587_v38 = vmul.f32 -1.442695, %v1904_v35  ;;  %v1907_v39 = vadd.f32 %v1578_v8, %v619_v36  ;;  %1703 = vpow2.f32 %v1584_v34  ;;  %v1078_v8 = vmul.f32 %v1932_v61, %v1012_v60 }
  0xe3   : > { %v1072_v34 = vsel %vm1954_vm6, 0.0, %v1062_v17  ;;  %vm2040_vm12 = vcmp.eq.s32.totalorder %v859_v37, 0  ;;  %vm2048_vm14 = vcmp.eq.s32.totalorder %v859_v37, 7  ;;  %v2077_v17 = vld [vmem:[%s2423_s5 + $0x6] ss:$0 sm:$0xff] }
  0xe4   : > { %1705 = vpow2.f32 %v1587_v38  ;;  %v1585_v42 = vmul.f32 -1.442695, %v1907_v39  ;;  %v1099_v32 = vadd.f32 %v1091_v5, %v1078_v8  ;;  %v2430_v38 = vand.u32 7, %v1948_v12 }
  0xe5   : > { %v1694_v43 = vpop.eup %1693 }
  0xe6   : > { %v725_v44 = vadd.f32 1.0, %v1694_v43  ;;  %1707 = vpow2.f32 %v1585_v42  ;;  %vm2142_vm15 = vcmp.eq.s32.totalorder %v2430_v38, 0 }
  0xe7   : > { %v1696_v45 = vpop.eup %1695 }
  0xe8   : > { %1709 = vrcp.f32 %v725_v44  ;;  %v723_v46 = vadd.f32 1.0, %v1696_v45 }
  0xe9   : > { %v1698_v49 = vpop.eup %1697 }
  0xea   : > { %1711 = vrcp.f32 %v723_v46  ;;  %v726_v50 = vadd.f32 1.0, %v1698_v49  ;;  %v2014_v49 = vmul.f32 %v2002_v41, %v1072_v34 }
  0xeb   : > { %v1700_v51 = vpop.eup %1699 }
  0xec   : > { %1713 = vrcp.f32 %v726_v50  ;;  %v724_v55 = vadd.f32 1.0, %v1700_v51  ;;  %2444 = vst [vmem:[#allocation3_spill] sm:$0xff] %v2014_v49 }
  0xed   : > { %v1702_v56 = vpop.eup %1701 }
  0xee   : > { %1715 = vrcp.f32 %v724_v55  ;;  %v729_v3 = vadd.f32 1.0, %v1702_v56 }
  0xef   : > { %v1704_v62 = vpop.eup %1703 }
  0xf0   : > { %v727_v15 = vadd.f32 1.0, %v1704_v62  ;;  %1717 = vrcp.f32 %v729_v3 }
  0xf1   : > { %v1706_v4 = vpop.eup %1705 }
  0xf2   : > { %v730_v19 = vadd.f32 1.0, %v1706_v4  ;;  %1719 = vrcp.f32 %v727_v15  ;;  %v2060_v4 = vld [vmem:[%s2423_s5 + $0x3] ss:$0 sm:$0xff] }
  0xf3   : > { %v1708_v13 = vpop.eup %1707 }
  0xf4   : > { %v728_v28 = vadd.f32 1.0, %v1708_v13  ;;  %1721 = vrcp.f32 %v730_v19 }
  0xf5   : > { %v1710_v23 = vpop.eup %1709 }
  0xf6   : > { %v1977_v29 = vmul.f32 %v1710_v23, %v1886_v10  ;;  %v1995_v10 = vld [vmem:[%s2423_s5 + $0x7] ss:$0 sm:$0xff]  ;;  %1723 = vrcp.f32 %v728_v28 }
  0xf7   : > { %v1712_v36 = vpop.eup %1711  ;;  %v2006_v43 = vmul.f32 0.0, %v1995_v10 }
  0xf8   : > { %v987_v46 = vrot.slane %v1977_v29, 7  ;;  %v2011_v47 = vmul.f32 %v1712_v36, %v1889_v14  ;;  %v1038_v50 = vrot.slane %v1977_v29, 1  ;;  %v2019_v51 = vmul.f32 %v1937_v63, %v1977_v29 }
  0xf9   : > { %2443 = vst [vmem:[#allocation2_spill] sm:$0xff] %v2006_v43  ;;  %v1714_v45 = vpop.eup %1713  ;;  %v2023_v52 = vmul.f32 %v1982_v31, %v1977_v29  ;;  %v2030_v14 = vmul.f32 %v1995_v10, %v1977_v29 }
  0xfa   : > { %v2026_v53 = vmul.f32 %v1714_v45, %v1892_v18  ;;  %v983_v55 = vrot.slane %v2011_v47, 7  ;;  %v1034_v57 = vrot.slane %v2011_v47, 1  ;;  %v1092_v60 = vmul.f32 %v1937_v63, %v2011_v47 }
  0xfb   : > { %v1716_v54 = vpop.eup %1715  ;;  %v1146_v5 = vmul.f32 %v1982_v31, %v2011_v47 }
  0xfc   : > { %v2428_v6 = vrot.slane %v2026_v53, 7  ;;  %v2427_v8 = vrot.slane %v2026_v53, 1  ;;  %v1095_v11 = vmul.f32 %v1937_v63, %v2026_v53  ;;  %v984_v13 = vsel %vm981_vm3, %v1911_v48, %v983_v55 }
  0xfd   : > { %v1035_v15 = vsel %vm1032_vm5, %v1941_v2, %v1034_v57  ;;  %v1149_v16 = vmul.f32 %v1982_v31, %v2026_v53  ;;  %v754_v19 = vmul.f32 %v1716_v54, %v1895_v22  ;;  %v1013_v23 = vsel %vm1964_vm7, 0.0, %v984_v13 }
  0xfe   : > { %v1063_v28 = vsel %vm1968_vm8, 0.0, %v1035_v15  ;;  %v990_v29 = vsel %vm981_vm3, %v987_v46, %v2428_v6  ;;  %v1041_v34 = vsel %vm1032_vm5, %v1038_v50, %v2427_v8  ;;  %v1079_v36 = vmul.f32 %v1932_v61, %v1013_v23  ;;  %v1718_v15 = vpop.eup %1717 }
  0xff   : > { %v1112_v37 = vmul.f32 %v2055_v0, %v1063_v28  ;;  %v1133_v22 = vmul.f32 %v2060_v4, %v1013_v23  ;;  %v1016_v24 = vsel %vm1986_vm10, 0.0, %v990_v29  ;;  %v1066_v45 = vsel %vm1972_vm9, 0.0, %v1041_v34 }
 0x100   : > { %v1082_v47 = vmul.f32 %v1932_v61, %v1016_v24  ;;  %v1136_v54 = vmul.f32 %v2060_v4, %v1016_v24  ;;  %v1198_v13 = vmul.f32 %v2077_v17, %v1016_v24  ;;  %v1100_v28 = vadd.f32 %v1092_v60, %v1079_v36  ;;  %v1720_v60 = vpop.eup %1719 }
 0x101   : > { %v1120_v23 = vadd.f32 %v1112_v37, %v1099_v32  ;;  %v1154_v44 = vadd.f32 %v1146_v5, %v1133_v22  ;;  %v1211_v33 = vmul.f32 %v1995_v10, %v2026_v53  ;;  %v1115_v8 = vmul.f32 %v2055_v0, %v1066_v45 }
 0x102   : > { %v2107_v29 = vadd.f32 %v1095_v11, %v1082_v47  ;;  %v2110_v6 = vadd.f32 %v1149_v16, %v1136_v54  ;;  %v1169_v27 = vmul.f32 %v2098_v25, %v1066_v45  ;;  %v1231_v40 = vmul.f32 %v2002_v41, %v1066_v45  ;;  %v1722_v16 = vpop.eup %1721 }
 0x103   : > { %v2113_v34 = vadd.f32 %v1211_v33, %v1198_v13  ;;  %v985_v24 = vrot.slane %v754_v19, 7  ;;  %v1036_v7 = vrot.slane %v754_v19, 1  ;;  %v1093_v32 = vmul.f32 %v1937_v63, %v754_v19  ;;  %v1724_v54 = vpop.eup %1723 }
 0x104   : > { %v1147_v5 = vmul.f32 %v1982_v31, %v754_v19  ;;  %v1209_v11 = vmul.f32 %v1995_v10, %v754_v19  ;;  %v2120_v36 = vmul.f32 %v1718_v15, %v1898_v26 }
 0x105   : > { %v986_v37 = vsel %vm981_vm3, %v983_v55, %v985_v24  ;;  %v988_v22 = vsel %vm981_vm3, %v985_v24, %v987_v46  ;;  %v1037_v47 = vsel %vm1032_vm5, %v1034_v57, %v1036_v7  ;;  %v1039_v45 = vsel %vm1032_vm5, %v1036_v7, %v1038_v50 }
 0x106   : > { %v1014_v13 = vsel %vm2040_vm12, 0.0, %v986_v37  ;;  %v1015_v33 = vsel %vm2044_vm13, 0.0, %v988_v22  ;;  %v1064_v26 = vsel %vm2033_vm11, 0.0, %v1037_v47  ;;  %v1065_v19 = vsel %vm2048_vm14, 0.0, %v1039_v45 }
 0x107   : > { %v1080_v55 = vmul.f32 %v1932_v61, %v1014_v13  ;;  %v1081_v46 = vmul.f32 %v1932_v61, %v1015_v33  ;;  %v1113_v57 = vmul.f32 %v2055_v0, %v1064_v26  ;;  %v2138_v7 = vmul.f32 %v1720_v60, %v1901_v30 }
 0x108   : > { %v1114_v62 = vmul.f32 %v2055_v0, %v1065_v19  ;;  %v1134_v18 = vmul.f32 %v2060_v4, %v1014_v13  ;;  %v1135_v3 = vmul.f32 %v2060_v4, %v1015_v33  ;;  %v1167_v30 = vmul.f32 %v2098_v25, %v1064_v26 }
 0x109   : > { %v1101_v15 = vadd.f32 %v1093_v32, %v1080_v55  ;;  %v1102_v24 = vadd.f32 %v2019_v51, %v1081_v46  ;;  %v1168_v60 = vmul.f32 %v2098_v25, %v1065_v19  ;;  %v1196_v37 = vmul.f32 %v2077_v17, %v1014_v13 }
 0x10a   : > { %v1155_v59 = vadd.f32 %v1147_v5, %v1134_v18  ;;  %v1156_v9 = vadd.f32 %v2023_v52, %v1135_v3  ;;  %v1175_v22 = vadd.f32 %v1167_v30, %v1154_v44  ;;  %v1197_v47 = vmul.f32 %v2077_v17, %v1015_v33 }
 0x10b   : > { %v1121_v45 = vadd.f32 %v1113_v57, %v1100_v28  ;;  %v1122_v38 = vadd.f32 %v1114_v62, %v1101_v15  ;;  %v1217_v42 = vadd.f32 %v1209_v11, %v1196_v37  ;;  %v1230_v49 = vmul.f32 %v2002_v41, %v1065_v19  ;;  %v2170_v28 = vld [vmem:[%s2424_s6] ss:$0 sm:$0xff] }
 0x10c   : > { %v1176_v43 = vadd.f32 %v1168_v60, %v1155_v59  ;;  %v1177_v26 = vadd.f32 %v1169_v27, %v1156_v9  ;;  %v1183_v32 = vadd.f32 %v1175_v22, %v1120_v23  ;;  %v1218_v51 = vadd.f32 %v2030_v14, %v1197_v47 }
 0x10d   : > { %v2163_v55 = vadd.f32 %v1115_v8, %v1102_v24  ;;  %v1238_v46 = vadd.f32 %v1230_v49, %v1217_v42  ;;  %v995_v5 = vrot.slane %v2120_v36, 7  ;;  %v1046_v52 = vrot.slane %v2120_v36, 1 }
 0x10e   : > { %v1184_v44 = vadd.f32 %v1176_v43, %v1121_v45  ;;  %v1185_v13 = vadd.f32 %v1177_v26, %v1122_v38  ;;  %v1239_v33 = vadd.f32 %v1231_v40, %v1218_v51  ;;  %v2174_v23 = vmul.f32 %v1937_v63, %v2120_v36 }
 0x10f   : > { %v1246_v14 = vadd.f32 %v1238_v46, %v1183_v32  ;;  %v2178_v42 = vmul.f32 %v1982_v31, %v2120_v36  ;;  %v991_v49 = vrot.slane %v2138_v7, 7  ;;  %v1042_v43 = vrot.slane %v2138_v7, 1 }
 0x110   : > { %v2457_v38 = vand.u32 7, %v1960_v20  ;;  %v2460_v8 = vand.u32 7, %v1923_v58  ;;  %v2463_v11 = vand.u32 7, %v1950_v1  ;;  %v1247_v57 = vadd.f32 %v1239_v33, %v1184_v44 }
 0x111   : > { %v2202_v62 = vmul.f32 %v1995_v10, %v2120_v36  ;;  %v1096_v18 = vmul.f32 %v1937_v63, %v2138_v7  ;;  %v1150_v58 = vmul.f32 %v1982_v31, %v2138_v7  ;;  %v2215_v15 = vadd.f32 %v2170_v28, %v1246_v14 }
 0x112   : > { %vm2184_vm2 = vcmp.eq.s32.totalorder %v2457_v38, 0  ;;  %vm2190_vm4 = vcmp.eq.s32.totalorder %v2460_v8, 0  ;;  %vm2196_vm6 = vcmp.eq.s32.totalorder %v2463_v11, 7  ;;  %v2466_v3 = vmov %v2457_v38 }
 0x113   : > { %vm2210_vm7 = vcmp.eq.s32.totalorder %v2466_v3, 7  ;;  %v2469_v24 = vrot.slane %v2026_v53, 7  ;;  %v2470_v37 = vrot.slane %v2026_v53, 1  ;;  %v760_v20 = vmul.f32 %v1722_v16, %v1904_v35 }
 0x114   : > { %v2229_v9 = vadd.f32 %v2170_v28, %v1247_v57  ;;  %v2236_v45 = vmul.f32 %v1724_v54, %v1907_v39  ;;  %v1599_v26 = vmul.f32 -1.442695, %v2215_v15  ;;  %v2471_v46 = vmov %v2463_v11 }
 0x115   : > { %v992_v60 = vsel %vm981_vm3, %v2469_v24, %v991_v49  ;;  %v1043_v59 = vsel %vm1032_vm5, %v2470_v37, %v1042_v43  ;;  %vm2248_vm8 = vcmp.eq.s32.totalorder %v2471_v46, 0  ;;  %v2474_v54 = vand.u32 7, %v1962_v21 }
 0x116   : > { %v1017_v22 = vsel %vm2142_vm15, 0.0, %v992_v60  ;;  %v1067_v47 = vsel %vm2148_vm1, 0.0, %v1043_v59  ;;  %v1600_v16 = vmul.f32 -1.442695, %v2229_v9  ;;  %1725 = vpow2.f32 %v1599_v26 }
 0x117   : > { %v1083_v53 = vmul.f32 %v1932_v61, %v1017_v22  ;;  %v1116_v32 = vmul.f32 %v2055_v0, %v1067_v47  ;;  %v1137_v35 = vmul.f32 %v2060_v4, %v1017_v22  ;;  %v1170_v51 = vmul.f32 %v2098_v25, %v1067_v47 }
 0x118   : > { %v1199_v50 = vmul.f32 %v2077_v17, %v1017_v22  ;;  %v1232_v56 = vmul.f32 %v2002_v41, %v1067_v47  ;;  %vm2254_vm9 = vcmp.eq.s32.totalorder %v2474_v54, 0  ;;  %v1212_v38 = vmul.f32 %v1995_v10, %v2138_v7 }
 0x119   : > { %v2258_v33 = vadd.f32 %v1096_v18, %v1083_v53  ;;  %v2261_v14 = vadd.f32 %v1116_v32, %v2107_v29  ;;  %v2477_v1 = vand.u32 7, %v1948_v12  ;;  %1727 = vpow2.f32 %v1600_v16 }
 0x11a   : > { %v2271_v11 = vadd.f32 %v1150_v58, %v1137_v35  ;;  %v2274_v57 = vadd.f32 %v1170_v51, %v2110_v6  ;;  %v1240_v18 = vadd.f32 %v1232_v56, %v2113_v34  ;;  %v2480_v29 = vmov %v2474_v54 }
 0x11b   : > { %vm2267_vm10 = vcmp.eq.s32.totalorder %v2477_v1, 7  ;;  %vm2279_vm11 = vcmp.eq.s32.totalorder %v2480_v29, 7  ;;  %v2283_v24 = vadd.f32 %v1212_v38, %v1199_v50  ;;  %v997_v12 = vrot.slane %v760_v20, 7  ;;  %v2483_v38 = vld [vmem:[#allocation2_spill] sm:$0xff] }
 0x11c   : > { %v1048_v60 = vrot.slane %v760_v20, 1  ;;  %v1153_v37 = vmul.f32 %v1982_v31, %v760_v20  ;;  %v1248_v59 = vadd.f32 %v1240_v18, %v1185_v13  ;;  %v1215_v58 = vmul.f32 %v1995_v10, %v760_v20 }
 0x11d   : > { %v993_v6 = vrot.slane %v2236_v45, 7  ;;  %v1044_v22 = vrot.slane %v2236_v45, 1  ;;  %v998_v21 = vsel %vm981_vm3, %v995_v5, %v997_v12  ;;  %v1000_v34 = vsel %vm981_vm3, %v997_v12, %v1911_v48 }
 0x11e   : > { %v1049_v47 = vsel %vm1032_vm5, %v1046_v52, %v1048_v60  ;;  %v1051_v13 = vsel %vm1032_vm5, %v1048_v60, %v1941_v2  ;;  %v2300_v20 = vadd.f32 %v2170_v28, %v1248_v59  ;;  %v1020_v26 = vsel %vm2184_vm2, 0.0, %v998_v21  ;;  %v2484_v59 = vld [vmem:[#allocation3_spill] sm:$0xff] }
 0x11f   : > { %v1021_v53 = vsel %vm2190_vm4, 0.0, %v1000_v34  ;;  %v1070_v32 = vsel %vm2196_vm6, 0.0, %v1049_v47  ;;  %v1071_v48 = vsel %vm2210_vm7, 0.0, %v1051_v13  ;;  %v1140_v16 = vmul.f32 %v2060_v4, %v1020_v26 }
 0x120   : > { %v1119_v35 = vmul.f32 %v2055_v0, %v1070_v32  ;;  %v1173_v2 = vmul.f32 %v2098_v25, %v1070_v32  ;;  %v1601_v51 = vmul.f32 -1.442695, %v2300_v20  ;;  %v1174_v40 = vmul.f32 %v2098_v25, %v1071_v48 }
 0x121   : > { %v1202_v50 = vmul.f32 %v2077_v17, %v1020_v26  ;;  %v1203_v27 = vmul.f32 %v2077_v17, %v1021_v53  ;;  %v1161_v56 = vadd.f32 %v1153_v37, %v1140_v16  ;;  %v1235_v19 = vmul.f32 %v2002_v41, %v1070_v32 }
 0x122   : > { %v1236_v30 = vmul.f32 %v2002_v41, %v1071_v48  ;;  %v994_v46 = vsel %vm981_vm3, %v991_v49, %v993_v6  ;;  %1729 = vpow2.f32 %v1601_v51  ;;  %v996_v18 = vsel %vm981_vm3, %v993_v6, %v995_v5 }
 0x123   : > { %v1223_v54 = vadd.f32 %v1215_v58, %v1202_v50  ;;  %v1224_v1 = vadd.f32 %v2483_v38, %v1203_v27  ;;  %v1182_v29 = vadd.f32 %v1174_v40, %v1161_v56  ;;  %v1018_v12 = vsel %vm2254_vm9, 0.0, %v994_v46 }
 0x124   : > { %v1019_v60 = vsel %vm2248_vm8, 0.0, %v996_v18  ;;  %v1045_v37 = vsel %vm1032_vm5, %v1042_v43, %v1044_v22  ;;  %v1047_v21 = vsel %vm1032_vm5, %v1044_v22, %v1046_v52  ;;  %v1084_v39 = vmul.f32 %v1932_v61, %v1018_v12  ;;  %v1726_v43 = vpop.eup %1725 }
 0x125   : > { %v1244_v49 = vadd.f32 %v1236_v30, %v1223_v54  ;;  %v1245_v58 = vadd.f32 %v2484_v59, %v1224_v1  ;;  %v1068_v5 = vsel %vm2267_vm10, 0.0, %v1045_v37  ;;  %v1069_v44 = vsel %vm2279_vm11, 0.0, %v1047_v21 }
 0x126   : > { %v1085_v6 = vmul.f32 %v1932_v61, %v1019_v60  ;;  %v1097_v7 = vmul.f32 %v1937_v63, %v2236_v45  ;;  %v1117_v34 = vmul.f32 %v2055_v0, %v1068_v5  ;;  %v1118_v36 = vmul.f32 %v2055_v0, %v1069_v44  ;;  %v1728_v22 = vpop.eup %1727 }
 0x127   : > { %v1138_v52 = vmul.f32 %v2060_v4, %v1018_v12  ;;  %v1139_v8 = vmul.f32 %v2060_v4, %v1019_v60  ;;  %v1293_v47 = vadd.f32 1.0, %v1726_v43  ;;  %v1151_v61 = vmul.f32 %v1982_v31, %v2236_v45 }
 0x128   : > { %v1105_v3 = vadd.f32 %v1097_v7, %v1084_v39  ;;  %v1106_v13 = vadd.f32 %v2174_v23, %v1085_v6  ;;  %v1294_v26 = vadd.f32 1.0, %v1728_v22  ;;  %v1125_v63 = vadd.f32 %v1117_v34, %v2258_v33 }
 0x129   : > { %v1160_v53 = vadd.f32 %v2178_v42, %v1139_v8  ;;  %v1171_v32 = vmul.f32 %v2098_v25, %v1068_v5  ;;  %1731 = vrcp.f32 %v1293_v47  ;;  %v1159_v16 = vadd.f32 %v1151_v61, %v1138_v52 }
 0x12a   : > { %v1126_v0 = vadd.f32 %v1118_v36, %v1105_v3  ;;  %v1127_v48 = vadd.f32 %v1119_v35, %v1106_v13  ;;  %1733 = vrcp.f32 %v1294_v26  ;;  %v1172_v4 = vmul.f32 %v2098_v25, %v1069_v44 }
 0x12b   : > { %v1179_v51 = vadd.f32 %v1171_v32, %v2271_v11  ;;  %v1181_v23 = vadd.f32 %v1173_v2, %v1160_v53  ;;  %v1200_v31 = vmul.f32 %v2077_v17, %v1018_v12  ;;  %v1201_v50 = vmul.f32 %v2077_v17, %v1019_v60 }
 0x12c   : > { %v1190_v40 = vadd.f32 %v1182_v29, %v1127_v48  ;;  %v1213_v42 = vmul.f32 %v1995_v10, %v2236_v45  ;;  %v1180_v33 = vadd.f32 %v1172_v4, %v1159_v16  ;;  %v1233_v35 = vmul.f32 %v2002_v41, %v1068_v5 }
 0x12d   : > { %v1187_v27 = vadd.f32 %v1179_v51, %v2261_v14  ;;  %v1189_v56 = vadd.f32 %v1181_v23, %v1126_v0  ;;  %v1222_v25 = vadd.f32 %v2202_v62, %v1201_v50  ;;  %v1234_v11 = vmul.f32 %v2002_v41, %v1069_v44 }
 0x12e   : > { %v1221_v30 = vadd.f32 %v1213_v42, %v1200_v31  ;;  %v1253_v2 = vadd.f32 %v1245_v58, %v1190_v40  ;;  %v1186_v46 = vadd.f32 %v2274_v57, %v2163_v55  ;;  %v1188_v54 = vadd.f32 %v1180_v33, %v1125_v63 }
 0x12f   : > { %v1241_v17 = vadd.f32 %v1233_v35, %v2283_v24  ;;  %v1252_v38 = vadd.f32 %v1244_v49, %v1189_v56  ;;  %v1730_v10 = vpop.eup %1729  ;;  %v1243_v1 = vadd.f32 %v1235_v19, %v1222_v25  ;;  %vm1357_vm3 = vcmask 519168  }
 0x130   : > { %v1242_v45 = vadd.f32 %v1234_v11, %v1221_v30  ;;  %v1268_v14 = vadd.f32 %v2170_v28, %v1253_v2  ;;  %v1295_v18 = vadd.f32 1.0, %v1730_v10  ;;  %vm1381_vm5 = vcmask 523264  }
 0x131   : > { %v1249_v29 = vadd.f32 %v1241_v17, %v1186_v46  ;;  %v1267_v12 = vadd.f32 %v2170_v28, %v1252_v38  ;;  %v1251_v60 = vadd.f32 %v1243_v1, %v1188_v54 }
 0x132   : > { %v1250_v62 = vadd.f32 %v1242_v45, %v1187_v27  ;;  %v1606_v41 = vmul.f32 -1.442695, %v1268_v14  ;;  %1735 = vrcp.f32 %v1295_v18 }
 0x133   : > { %v1264_v55 = vadd.f32 %v2170_v28, %v1249_v29  ;;  %v1605_v57 = vmul.f32 -1.442695, %v1267_v12  ;;  %v1266_v37 = vadd.f32 %v2170_v28, %v1251_v60 }
 0x134   : > { %v1265_v24 = vadd.f32 %v2170_v28, %v1250_v62  ;;  %1737 = vpow2.f32 %v1606_v41 }
 0x135   : > { %v1602_v19 = vmul.f32 -1.442695, %v1264_v55  ;;  %1739 = vpow2.f32 %v1605_v57  ;;  %v1604_v59 = vmul.f32 -1.442695, %v1266_v37 }
 0x136   : > { %v1603_v49 = vmul.f32 -1.442695, %v1265_v24  ;;  %v1732_v58 = vpop.eup %1731 }
 0x137   : > { %1741 = vpow2.f32 %v1602_v19  ;;  %v1734_v21 = vpop.eup %1733  ;;  %v1317_v5 = vmul.f32 %v1732_v58, %v2215_v15 }
 0x138   : > { %1743 = vpow2.f32 %v1603_v49  ;;  %v1318_v28 = vmul.f32 %v1734_v21, %v2229_v9 }
 0x139   : > { %1745 = vpow2.f32 %v1604_v59  ;;  %v1622_v44 = vpack.c.bf16 %v1317_v5, %v1317_v5 }
 0x13a   : > { %v1623_v39 = vpack.c.bf16 %v1318_v28, %v1318_v28  ;;  %v1325_v61 = vpack.c.bf16 %v1318_v28, %v1317_v5  ;;  %v1372_v5 = vld [vmem:[%s1855_s14] sm:$0x1] }
 0x13b   : > { %1358 = vst.msk [vmem:[%s2378_s15] sm:$0xf] %vm1357_vm3, %v1622_v44 }
 0x13c   : > { %1359 = vst.msk [vmem:[%s2378_s15 + $0x4] sm:$0xf] %vm1357_vm3, %v1623_v39  ;;  %v1373_v63 = vunpack.c.l.bf16 %v1325_v61  ;;  %v1374_v32 = vunpack.c.h.bf16 %v1325_v61 }
 0x13e   : > { %v1382_v31 = vsel %vm1381_vm5, %v1373_v63, 0.0  ;;  %v1383_v42 = vsel %vm1381_vm5, %v1374_v32, 0.0 }
 0x13f   : > { %v1736_v15 = vpop.eup %1735  ;;  %v1384_v46 = vadd.f32 %v1383_v42, %v1382_v31 }
 0x140   : > { %v1319_v7 = vmul.f32 %v1736_v15, %v2300_v20 }
 0x141   : > { %v1738_v6 = vpop.eup %1737 }
 0x142   : > { %v1740_v43 = vpop.eup %1739  ;;  %v1300_v34 = vadd.f32 1.0, %v1738_v6  ;;  %v1624_v36 = vpack.c.bf16 %v1319_v7, %v1319_v7 }
 0x143   : > { %v1299_v52 = vadd.f32 1.0, %v1740_v43 }
 0x144   : > { %v1742_v8 = vpop.eup %1741  ;;  %1747 = vrcp.f32 %v1300_v34  ;;  %1360 = vst.msk [vmem:[%s2378_s15 + $0x8] sm:$0xf] %vm1357_vm3, %v1624_v36 }
 0x145   : > { %v1744_v9 = vpop.eup %1743  ;;  %v1296_v22 = vadd.f32 1.0, %v1742_v8  ;;  %1749 = vrcp.f32 %v1299_v52 }
 0x146   : > { %v1746_v47 = vpop.eup %1745  ;;  %v1297_v3 = vadd.f32 1.0, %v1744_v9 }
 0x147   : > { %v1298_v13 = vadd.f32 1.0, %v1746_v47  ;;  %1751 = vrcp.f32 %v1296_v22 }
 0x148   : > { %1753 = vrcp.f32 %v1297_v3 }
 0x149   : > { %1755 = vrcp.f32 %v1298_v13 }
 0x151   : > { %v1748_v20 = vpop.eup %1747 }
 0x152   : > { %v1750_v26 = vpop.eup %1749  ;;  %v1324_v53 = vmul.f32 %v1748_v20, %v1268_v14 }
 0x153   : > { %v1323_v0 = vmul.f32 %v1750_v26, %v1267_v12 }
 0x154   : > { %v1752_v48 = vpop.eup %1751  ;;  %v1629_v16 = vpack.c.bf16 %v1324_v53, %v1324_v53 }
 0x155   : > { %v1754_v4 = vpop.eup %1753  ;;  %v1320_v51 = vmul.f32 %v1752_v48, %v1264_v55  ;;  %v1628_v23 = vpack.c.bf16 %v1323_v0, %v1323_v0  ;;  %v1328_v54 = vpack.c.bf16 %v1324_v53, %v1323_v0 }
 0x156   : > { %v1756_v40 = vpop.eup %1755  ;;  %v1321_v50 = vmul.f32 %v1754_v4, %v1265_v24  ;;  %1365 = vst.msk [vmem:[%s2378_s15 + $0x1c] sm:$0xf] %vm1357_vm3, %v1629_v16 }
 0x157   : > { %v1322_v33 = vmul.f32 %v1756_v40, %v1266_v37  ;;  %v1326_v27 = vpack.c.bf16 %v1320_v51, %v1319_v7  ;;  %v1625_v56 = vpack.c.bf16 %v1320_v51, %v1320_v51  ;;  %1364 = vst.msk [vmem:[%s2378_s15 + $0x18] sm:$0xf] %vm1357_vm3, %v1628_v23  ;;  %v1379_v29 = vunpack.c.l.bf16 %v1328_v54 }
 0x158   : > { %v1626_v35 = vpack.c.bf16 %v1321_v50, %v1321_v50  ;;  %v1380_v62 = vunpack.c.h.bf16 %v1328_v54 }
 0x159   : > { %v1327_v30 = vpack.c.bf16 %v1322_v33, %v1321_v50  ;;  %v1627_v25 = vpack.c.bf16 %v1322_v33, %v1322_v33  ;;  %1361 = vst.msk [vmem:[%s2378_s15 + $0xc] sm:$0xf] %vm1357_vm3, %v1625_v56  ;;  %v1375_v11 = vunpack.c.l.bf16 %v1326_v27  ;;  %v1376_v2 = vunpack.c.h.bf16 %v1326_v27 }
 0x15a   : > { %1362 = vst.msk [vmem:[%s2378_s15 + $0x10] sm:$0xf] %vm1357_vm3, %v1626_v35  ;;  %v1393_v55 = vsel %vm1381_vm5, %v1379_v29, 0.0  ;;  %v1395_v24 = vsel %vm1381_vm5, %v1380_v62, 0.0 }
 0x15b   : > { %1363 = vst.msk [vmem:[%s2378_s15 + $0x14] sm:$0xf] %vm1357_vm3, %v1627_v25  ;;  %v1377_v17 = vunpack.c.l.bf16 %v1327_v30  ;;  %v1385_v38 = vsel %vm1381_vm5, %v1375_v11, 0.0  ;;  %v1378_v45 = vunpack.c.h.bf16 %v1327_v30  ;;  %v1387_v1 = vsel %vm1381_vm5, %v1376_v2, 0.0 }
 0x15c   : > { %v1386_v10 = vadd.f32 %v1385_v38, %v1384_v46 }
 0x15d   : > { %v1389_v14 = vsel %vm1381_vm5, %v1377_v17, 0.0  ;;  %v1391_v60 = vsel %vm1381_vm5, %v1378_v45, 0.0 }
 0x15e   : > { %v1388_v18 = vadd.f32 %v1387_v1, %v1386_v10 }
 0x160   : > { %v1390_v12 = vadd.f32 %v1389_v14, %v1388_v18 }
 0x162   : > { %v1392_v41 = vadd.f32 %v1391_v60, %v1390_v12 }
 0x164   : > { %v1394_v57 = vadd.f32 %v1393_v55, %v1392_v41 }
 0x166   : > { %v1396_v37 = vadd.f32 %v1395_v24, %v1394_v57 }
 0x168   : > { %v1397_v19 = vrot.slane %v1396_v37, 4 }
 0x16a   : > { %v1398_v49 = vadd.f32 %v1397_v19, %v1396_v37 }
 0x16c   : > { %v1399_v59 = vrot.slane %v1398_v49, 2 }
 0x16e   : > { %v1400_v58 = vadd.f32 %v1399_v59, %v1398_v49 }
 0x170   : > { %v1401_v21 = vrot.slane %v1400_v58, 1 }
 0x172   : > { %v1402_v28 = vadd.f32 %v1401_v21, %v1400_v58 }
 0x174   : > { %v1403_v44 = vadd.f32 %v1402_v28, %v1372_v5 }
 0x176   : > { %1405 = vst.msk [vmem:[%s1855_s14] sm:$0x1] %vm1370_vm0, %v1403_v44 }
 0x177 PF: > { %s19_s29 = sadd.s32 1, %s1779_s29   ;;  %s2485_s27 = smov %s1775_s28 }
 0x178   : > { %p16_p5 = scmp.ge.s32.totalorder %s19_s29, 4   ;;  %s2486_s28 = smov %s2488_s30 }
 0x17a   :  { %18 = sbr.rel (!%p16_p5) target bundleno = 2 (0x2), region = 100 }

// kernel: _lambda_.11
= control target key start
LH: loop header
LB: loop body
LE: loop exit
PB: predicated region body
PF: predicated region fallthrough
CT: control target
= control target key end

     0   :  { %8 = vsyncpa [#allocation3], 0  ;;  %s885_s0 = inlined_call_operand.vmem [shape: bf16[2,64,24], index: 0, kind: input, shape index: {}]   ;;  %s886_s1 = inlined_call_operand.vmem [shape: bf16[24,64], index: 1, kind: input, shape index: {}]   ;;  %s887_s2 = inlined_call_operand.vmem [shape: f32[1,64], index: 2, kind: input, shape index: {}]   ;;  %s888_s3 = inlined_call_operand.hbm [shape: f32[2,1,64], index: 3, kind: output, shape index: {}]  }
   0x1   :  { %10 = vsyncpa [#allocation3 + $0x1], 0  ;;  %s745_s12 = smov 0   ;;  %s747_s13 = smov 0  }
   0x2   :  { %s749_s14 = smov 0   ;;  %s751_s15 = smov 0  }
   0x3   :  { %s753_s16 = smov 0   ;;  %s755_s17 = smov 0  }
   0x4 LB: > { %s497_s18 = sadd.s32 4294967295, %s721_s17   ;;  %s498_s19 = sadd.s32 4294967294, %s721_s17   ;;  %s721_s17 = sphi %s755_s17, %s16_s17   ;;  %s717_s16 = sphi %s753_s16, %s895_s16   ;;  %s713_s15 = sphi %s751_s15, %s894_s15   ;;  %s709_s14 = sphi %s749_s14, %s893_s14   ;;  %s705_s13 = sphi %s747_s13, %s892_s13   ;;  %s701_s12 = sphi %s745_s12, %s891_s12  }
   0x5   : > { %s28_s20 = sadd.s32 1, %s717_s16  ;;  %s105_s21 = sadd.s32 1, %s709_s14 }
   0x6   : > { %p30_p0 = scmp.ge.s32.totalorder %s28_s20, 2  ;;  %p115_p1 = scmp.ne.s32.totalorder %s709_s14, %s705_s13 }
   0x7   : > { %p116_p2 = scmp.eq.s32.totalorder %s497_s18, 1  ;;  %p121_p3 = scmp.ne.s32.totalorder %s705_s13, %s701_s12 }
   0x8   : > { %s897_s20 = smov (%p30_p0, %s28_s20), 0  ;;  %p122_p5 = scmp.eq.s32.totalorder %s498_s19, 1 }
   0x9   : > { %p785_p4 = por %p116_p2, %p115_p1  ;;  %s102_s23 = ssub.s32 %s717_s16, %s897_s20 }
   0xa   : > { %p501_p6 = scmp.ge.s32.totalorder %s721_s17, 1  ;;  %p103_p7 = scmp.eq.s32.totalorder %s102_s23, 0 }
   0xb   : > { %p792_p8 = por %p122_p5, %p121_p3  ;;  %p159_p9 = scmp.lt.s32.totalorder %s721_s17, 3 }
   0xc   : > { %s798_s25 = scalar_select %p103_p7, %s709_s14, %s105_s21  }
   0xd   : > { %p160_p10 = pnand %p501_p6, %p159_p9 }
   0xe   : > { %p187_p11 = scmp.lt.s32.totalorder (!%p160_p10), %s713_s15, 1  ;;  %s184_s8 = sand.u32 (!%p160_p10), 1, %s705_s13  }
   0xf   : > { %163 = sbr.rel (%p160_p10) target bundleno = 308 (0x134), region = 32  ;;  %s814_s9 = scalar_lea.vmem (!%p160_p10), [#allocation2], %s184_s8 }
  0x10   : > { %s523_s18 = sshll.u32 (!%p160_p10), %s713_s15, 4  ;;  %s428_s19 = sshll.u32 (!%p160_p10), %s814_s9, 4  ;;  %s429_s19 = int_to_ptr.vmem [resolvable:$true] %s428_s19 }
  0x11   : > { %s426_s26 = scalar_lea.hbm (!%p160_p10), %s888_s3, %s523_s18  ;;  %s416_s27 = scalar_lea.sflag (!%p160_p10), [#allocation3], %s184_s8 }
  0x12   : > { %s645_s28 = scalar_lea.vmem (!%p160_p10), %s429_s19, 16  ;;  %s724_s29 = smov (!%p160_p10), [#allocation2]  }
  0x13   : > { %p646_p12 = scmp.ne.s32.totalorder (!%p160_p10), %s429_s19, %s645_s28 }
  0x14   : > { %v607_v0 = vld [vmem:[%s886_s1 + $0x8] ss:$0 sps:$4 sm:$0xff]   ;;  %vm257_vm0 = vcmask 1043456   ;;  %v608_v1 = vld [vmem:[%s886_s1] sm:$0xff]   ;;  %s188_s30 = scalar_select %p187_p11, %s713_s15, 1  ;;  %vm244_vm1 = vcmask 195584  }
  0x15   : > { %549 = vmatprep.subr.msk.bf16.mxu0 %vm257_vm0, %v607_v0  ;;  %550 = vmatprep.subr.msk.bf16.mxu1 %vm257_vm0, %v607_v0  ;;  %v259_v2 = vsel %vm257_vm0, %v607_v0, 0  ;;  %vm386_vm2 = vcmask 516096   ;;  %v723_v7 = vmov 0.0   ;;  %v504_v8 = vld [vmem:[%s887_s2] ss:$0 sm:$0xff]  ;;  %vm389_vm3 = vcmask 523264   ;;  %p647_p13 = pnand %p646_p12, %p785_p4 }
  0x16   : > { %534 = vmatpush3.bf16.msra.mxu0 %v259_v2  ;;  %547 = vmatpush3.bf16.msra.mxu1 %v259_v2  ;;  %s526_s4 = sshll.u32 %s188_s30, 5  ;;  %387 = vst.msk [vmem:[%s814_s9] sm:$0x1] %vm386_vm2, %v723_v7  ;;  %s649_s30 = sshll.u32 %s724_s29, 4  ;;  %s650_s30 = int_to_ptr.vmem [resolvable:$false] %s649_s30 }
  0x17   : > { %535 = vmatprep.subr.bf16.mxu0 %v608_v1  ;;  %546 = vmatprep.subr.bf16.mxu1 %v608_v1  ;;  %s194_s7 = scalar_lea.vmem %s885_s0, %s526_s4  ;;  %p648_p0 = pneg %p647_p13 }
  0x18   : > { %v609_v3 = vld [vmem:[%s194_s7] sm:$0xff]   ;;  %v610_v4 = vld [vmem:[%s194_s7 + $0x10] sm:$0xff]   ;;  %v611_v5 = vld [vmem:[%s194_s7 + $0x8] sm:$0xff]   ;;  %s651_s15 = scalar_lea.vmem %s650_s30, 32  ;;  %p652_p1 = scmp.lt.s32.totalorder %s429_s19, %s650_s30 }
  0x19   : > { %537 = vmatprep.mubr.msk.bf16.mxu0 %vm244_vm1, %v609_v3  ;;  %541 = vmatprep.mubr.msk.bf16.mxu1 %vm244_vm1, %v610_v4  ;;  %v612_v6 = vld [vmem:[%s194_s7 + $0x18] sm:$0xff]   ;;  %p653_p2 = scmp.lt.s32.totalorder %s651_s15, %s645_s28 }
  0x1a   : > { %536 = vmatpush3.bf16.msra.mxu0 %v608_v1  ;;  %548 = vmatpush3.bf16.msra.mxu1 %v608_v1 }
  0x1b   : > { %p654_p3 = por %p653_p2, %p652_p1 }
  0x1d   : > { %538 = vmatmul.mubr.msk.bf16.vlgmr.msra.gmra.mxu0 %vm244_vm1, %v611_v5  ;;  %542 = vmatmul.mubr.msk.bf16.vlgmr.msra.gmra.mxu1 %vm244_vm1, %v612_v6  ;;  %p655_p5 = pnand %p654_p3, %p648_p0 }
  0xdd   : > { %v539_v9 = vpop.f32.mrf.mxu0  ;;  %v543_v11 = vpop.f32.mrf.mxu1 }
  0xde   : > { %v304_v10 = vadd.f32 %v539_v9, %v504_v8  ;;  %v823_v18 = vadd.f32 %v543_v11, %v504_v8 }
  0xdf   : > { %v295_v12 = vpop.f32.mrf.mxu0  ;;  %v311_v15 = vpop.f32.mrf.mxu1 }
  0xe0   : > { %v517_v13 = vmul.f32 -1.442695, %v304_v10  ;;  %v296_v14 = vadd.f32 %v504_v8, %v295_v12  ;;  %v821_v16 = vadd.f32 %v504_v8, %v311_v15  ;;  %v521_v29 = vmul.f32 -1.442695, %v823_v18 }
  0xe1   : > { %v540_v17 = vpop.f32.mrf.mxu0  ;;  %v544_v21 = vpop.f32.mrf.mxu1 }
  0xe2   : > { %613 = vpow2.f32 %v517_v13  ;;  %v515_v19 = vmul.f32 -1.442695, %v296_v14  ;;  %v307_v20 = vadd.f32 %v540_v17, %v504_v8  ;;  %v519_v22 = vmul.f32 -1.442695, %v821_v16 }
  0xe3   : > { %v298_v23 = vpop.f32.mrf.mxu0  ;;  %v826_v25 = vadd.f32 %v544_v21, %v504_v8  ;;  %v314_v27 = vpop.f32.mrf.mxu1 }
  0xe4   : > { %615 = vpow2.f32 %v515_v19  ;;  %v518_v24 = vmul.f32 -1.442695, %v307_v20  ;;  %v299_v26 = vadd.f32 %v504_v8, %v298_v23  ;;  %v315_v28 = vadd.f32 %v504_v8, %v314_v27 }
  0xe5   : > { %617 = vpow2.f32 %v519_v22  ;;  %v522_v32 = vmul.f32 -1.442695, %v826_v25  ;;  %v388_v22 = vld [vmem:[%s814_s9] sm:$0x1] }
  0xe6   : > { %619 = vpow2.f32 %v518_v24  ;;  %v516_v30 = vmul.f32 -1.442695, %v299_v26  ;;  %v520_v31 = vmul.f32 -1.442695, %v315_v28 }
  0xe8   : > { %621 = vpow2.f32 %v516_v30 }
  0xe9   : > { %623 = vpow2.f32 %v520_v31 }
  0xea   : > { %625 = vpow2.f32 %v521_v29 }
  0xeb   : > { %627 = vpow2.f32 %v522_v32 }
  0xef   : > { %v614_v33 = vpop.eup %613 }
  0xf0   : > { %v352_v36 = vadd.f32 1.0, %v614_v33 }
  0xf1   : > { %v616_v34 = vpop.eup %615 }
  0xf2   : > { %v618_v35 = vpop.eup %617  ;;  %v350_v37 = vadd.f32 1.0, %v616_v34 }
  0xf3   : > { %v620_v38 = vpop.eup %619  ;;  %v354_v42 = vadd.f32 1.0, %v618_v35 }
  0xf4   : > { %629 = vrcp.f32 %v350_v37  ;;  %v353_v39 = vadd.f32 1.0, %v620_v38 }
  0xf5   : > { %v622_v40 = vpop.eup %621  ;;  %631 = vrcp.f32 %v352_v36 }
  0xf6   : > { %v624_v41 = vpop.eup %623  ;;  %v351_v43 = vadd.f32 1.0, %v622_v40  ;;  %633 = vrcp.f32 %v353_v39 }
  0xf7   : > { %v626_v44 = vpop.eup %625  ;;  %v355_v45 = vadd.f32 1.0, %v624_v41 }
  0xf8   : > { %635 = vrcp.f32 %v351_v43  ;;  %v628_v46 = vpop.eup %627  ;;  %v356_v47 = vadd.f32 1.0, %v626_v44 }
  0xf9   : > { %637 = vrcp.f32 %v354_v42  ;;  %v357_v48 = vadd.f32 1.0, %v628_v46 }
  0xfa   : > { %639 = vrcp.f32 %v355_v45 }
  0xfb   : > { %641 = vrcp.f32 %v356_v47 }
  0xfc   : > { %643 = vrcp.f32 %v357_v48 }
 0x101   : > { %v630_v49 = vpop.eup %629 }
 0x102   : > { %v632_v50 = vpop.eup %631  ;;  %v374_v52 = vmul.f32 %v630_v49, %v296_v14 }
 0x103   : > { %v634_v51 = vpop.eup %633  ;;  %v376_v54 = vmul.f32 %v632_v50, %v304_v10 }
 0x104   : > { %v390_v57 = vsel %vm389_vm3, %v374_v52, 0.0  ;;  %v377_v58 = vmul.f32 %v634_v51, %v307_v20 }
 0x105   : > { %v636_v53 = vpop.eup %635  ;;  %v393_v62 = vsel %vm389_vm3, %v376_v54, 0.0 }
 0x106   : > { %v375_v55 = vmul.f32 %v636_v53, %v299_v26  ;;  %v638_v56 = vpop.eup %637  ;;  %v395_v2 = vsel %vm389_vm3, %v377_v58, 0.0 }
 0x107   : > { %v640_v60 = vpop.eup %639  ;;  %v378_v63 = vmul.f32 %v638_v56, %v821_v16 }
 0x108   : > { %v391_v59 = vsel %vm389_vm3, %v375_v55, 0.0  ;;  %v642_v0 = vpop.eup %641  ;;  %v379_v3 = vmul.f32 %v640_v60, %v315_v28 }
 0x109   : > { %v392_v61 = vadd.f32 %v391_v59, %v390_v57  ;;  %v644_v4 = vpop.eup %643  ;;  %v380_v6 = vmul.f32 %v642_v0, %v823_v18  ;;  %v397_v7 = vsel %vm389_vm3, %v378_v63, 0.0 }
 0x10a   : > { %v381_v9 = vmul.f32 %v644_v4, %v826_v25  ;;  %v399_v10 = vsel %vm389_vm3, %v379_v3, 0.0 }
 0x10b   : > { %v394_v1 = vadd.f32 %v393_v62, %v392_v61  ;;  %v401_v12 = vsel %vm389_vm3, %v380_v6, 0.0 }
 0x10c   : > { %v403_v14 = vsel %vm389_vm3, %v381_v9, 0.0 }
 0x10d   : > { %v396_v5 = vadd.f32 %v395_v2, %v394_v1 }
 0x10f   : > { %v398_v8 = vadd.f32 %v397_v7, %v396_v5 }
 0x111   : > { %v400_v11 = vadd.f32 %v399_v10, %v398_v8 }
 0x113   : > { %v402_v13 = vadd.f32 %v401_v12, %v400_v11 }
 0x115   : > { %v404_v15 = vadd.f32 %v403_v14, %v402_v13 }
 0x117   : > { %v405_v16 = vrot.slane %v404_v15, 4 }
 0x119   : > { %v406_v17 = vadd.f32 %v405_v16, %v404_v15 }
 0x11b   : > { %v407_v18 = vrot.slane %v406_v17, 2 }
 0x11d   : > { %v408_v19 = vadd.f32 %v407_v18, %v406_v17 }
 0x11f   : > { %v409_v20 = vrot.slane %v408_v19, 1 }
 0x121   : > { %v410_v21 = vadd.f32 %v409_v20, %v408_v19 }
 0x123   : > { %v411_v23 = vmul.f32 0.015625, %v410_v21 }
 0x125   : > { %v412_v24 = vadd.f32 %v411_v23, %v388_v22 }
 0x127   : > { %414 = vst.msk [vmem:[%s814_s9] sm:$0x1] %vm386_vm2, %v412_v24 }
 0x128   : > { %658 = shalt.err (!%p655_p5)
}
 0x129   : > { %s659_s4 = scalar_lea.hbm %s426_s26, 16  ;;  %s663_s7 = scalar_lea.hbm %s888_s3, 32 }
 0x12a   : > { %p660_p6 = scmp.ne.s32.totalorder %s426_s26, %s659_s4  ;;  %p664_p10 = scmp.lt.s32.totalorder %s426_s26, %s888_s3 }
 0x12b   : > { %p665_p11 = scmp.lt.s32.totalorder %s663_s7, %s659_s4 }
 0x12c   : > { %p661_p7 = pnand %p660_p6, %p785_p4 }
 0x12d   : > { %p666_p12 = por %p665_p11, %p664_p10 }
 0x12e   : > { %p662_p9 = pneg %p661_p7 }
 0x130   : > { %p667_p13 = pnand %p666_p12, %p662_p9 }
 0x132   : > { %670 = shalt.err (!%p667_p13)
}
 0x133   : > { %551 = dma.vmem_to_hbm [thread:$0]  (%p785_p4), %s429_s19, 16, %s426_s26, %s416_s27  }
 0x134 PF: > { %p557_p0 = scmp.ge.s32.totalorder %s721_s17, 2  ;;  %s440_s10 = sand.u32 1, %s701_s12  }
 0x135   : > { %s441_s11 = scalar_lea.sflag [#allocation3], %s440_s10 }
 0x136   : > { %p554_p1 = pnand %p557_p0, %p792_p8 }
 0x138   : > { %p555_p2 = pneg %p554_p1 }
 0x13a   : > { %696 = dma.done.wait (%p555_p2), %s441_s11, 16  }
 0x13b   : > { %698 = vsyncadd (%p555_p2), %s441_s11, 4294967280  ;;  %s16_s17 = sadd.s32 1, %s721_s17   ;;  %s891_s12 = smov %s705_s13 }
 0x13c   : > { %p13_p3 = scmp.ge.s32.totalorder %s16_s17, 4   ;;  %s892_s13 = smov %s709_s14 }
 0x13d   : > { %s893_s14 = smov %s798_s25  ;;  %s894_s15 = smov %s717_s16 }
 0x13e   : > { %s895_s16 = smov %s897_s20  ;;  %15 = sbr.rel (!%p13_p3) target bundleno = 4 (0x4), region = 71 }
 0x143   :  { %445 = vsyncpa [#allocation3], 1 }
 0x144   :  { %447 = vsyncpa [#allocation3 + $0x1], 1 }

</bundles_post_ra>
